<compile_context>
chip_gen: v5e
topology: v5e:2x2
jax: 0.10.0
libtpu: 0.0.40
codegen_flags: <defaults>
</compile_context>

<pallas_src>
import jax
import jax.numpy as jnp
from jax import lax
from jax.experimental import pallas as pl
from jax.experimental.pallas import tpu as pltpu


def _round_up(x, m):
    return ((x + m - 1) // m) * m


# ---------------------------------------------------------------------------
# Fused kernel: one M-tile of   y = SiLU( (x @ W) * scale + shift )
#   x_ref:     (TM, C1)
#   w_ref:     (C1, K)   K = kH*kW*C2 = 4*C2, column order (kh, kw, co)
#   scale_ref: (1, K)    folded BatchNorm scale (replicated over the 4 taps)
#   shift_ref: (1, K)    folded BatchNorm shift
#   o_ref:     (TM, K)
# ---------------------------------------------------------------------------
def _deconv_bn_silu_kernel(x_ref, w_ref, scale_ref, shift_ref, o_ref):
    x = x_ref[...].astype(jnp.float32)
    w = w_ref[...].astype(jnp.float32)
    c1 = x.shape[1]

    if c1 <= 16:
        # Tiny contraction: do it as c1 broadcast-FMAs on the VPU rather than
        # a massively under-utilized MXU matmul (and skip the MXU FIFO pop).
        acc = x[:, 0:1] * w[0:1, :]
        for ci in range(1, c1):
            acc = acc + x[:, ci:ci + 1] * w[ci:ci + 1, :]
    else:
        acc = jnp.dot(x, w, preferred_element_type=jnp.float32)

    y = acc * scale_ref[...] + shift_ref[...]
    sig = 1.0 / (1.0 + jnp.exp(-y))          # SiLU(y) = y * sigmoid(y)
    o_ref[...] = (y * sig).astype(o_ref.dtype)


# ---------------------------------------------------------------------------
# Wrapper: NCHW in -> NCHW out (PyTorch convention).
#   x_nchw: (N, C1, H, W)
#   w_mat:  (C1, 4*C2)  PyTorch weight (C1, C2, 2, 2) -> (C1, kh, kw, C2) flat
#   scale, shift: (C2,) folded eval-mode BatchNorm affine
# returns (N, C2, 2H, 2W)
# ---------------------------------------------------------------------------
@jax.jit
def conv_transpose_forward(x_nchw, w_mat, scale, shift):
    N, C1, H, W = x_nchw.shape
    K = w_mat.shape[1]
    C2 = K // 4
    M = N * H * W

    # Pixel-major rows for the per-pixel matmul.
    x_flat = jnp.transpose(x_nchw, (0, 2, 3, 1)).reshape(M, C1)

    # Row tiling (multiple of 8 sublanes). Parallel grid axis => pipelined DMA
    # + megacore sharding. (Raise TM to ~1024 for production-sized M.)
    TM = min(256, _round_up(M, 8))
    Mp = _round_up(M, TM)
    if Mp != M:
        x_flat = jnp.pad(x_flat, ((0, Mp - M), (0, 0)))

    scale_k = jnp.tile(scale, 4).reshape(1, K)   # column order is (kh, kw, co)
    shift_k = jnp.tile(shift, 4).reshape(1, K)

    y_flat = pl.pallas_call(
        _deconv_bn_silu_kernel,
        out_shape=jax.ShapeDtypeStruct((Mp, K), jnp.float32),
        grid=(Mp // TM,),
        in_specs=[
            pl.BlockSpec((TM, C1), lambda i: (i, 0)),
            pl.BlockSpec((C1, K), lambda i: (0, 0)),
            pl.BlockSpec((1, K), lambda i: (0, 0)),
            pl.BlockSpec((1, K), lambda i: (0, 0)),
        ],
        out_specs=pl.BlockSpec((TM, K), lambda i: (i, 0)),
        compiler_params=pltpu.CompilerParams(
            dimension_semantics=("parallel",)),
    )(x_flat, w_mat, scale_k, shift_k)

    # Interleave the 2x2 taps into the spatial dims (pure layout), back to NCHW.
    y = y_flat[:M].reshape(N, H, W, 2, 2, C2)
    y = jnp.transpose(y, (0, 1, 3, 2, 4, 5)).reshape(N, 2 * H, 2 * W, C2)
    return jnp.transpose(y, (0, 3, 1, 2))


# ---------------------------------------------------------------------------
# Pure-JAX reference: transposed conv via its fractionally-strided-conv
# identity (2x lhs dilation, k-1-p = 1 padding, spatially flipped kernel).
# ---------------------------------------------------------------------------
def conv_transpose_reference(x, w_iohw, scale, shift):
    w_oihw_flip = jnp.transpose(w_iohw, (1, 0, 2, 3))[:, :, ::-1, ::-1]
    y = lax.conv_general_dilated(
        x, w_oihw_flip, window_strides=(1, 1),
        padding=((1, 1), (1, 1)), lhs_dilation=(2, 2),
        dimension_numbers=('NCHW', 'OIHW', 'NCHW'))
    y = y * scale[None, :, None, None] + shift[None, :, None, None]
    return y * jax.nn.sigmoid(y)


if __name__ == "__main__":
    # Module config: ConvTranspose(c1=4, c2=8, k=2, s=2, p=0, bn=True, act=True)
    N, C1, H, W = 2, 4, 16, 16
    C2 = 8
    eps = 1e-5  # PyTorch BatchNorm2d default

    key = jax.random.PRNGKey(0)
    keys = jax.random.split(key, 6)

    x = jax.random.normal(keys[0], (N, C1, H, W), dtype=jnp.float32)

    # PyTorch ConvTranspose2d weight layout: (C1, C2, kH, kW); bias=False (bn=True).
    w_iohw = jax.random.normal(keys[1], (C1, C2, 2, 2), dtype=jnp.float32) * 0.3

    # BatchNorm (eval mode) parameters.
    gamma = 1.0 + 0.1 * jax.random.normal(keys[2], (C2,), dtype=jnp.float32)
    beta = 0.1 * jax.random.normal(keys[3], (C2,), dtype=jnp.float32)
    r_mean = 0.1 * jax.random.normal(keys[4], (C2,), dtype=jnp.float32)
    r_var = jnp.abs(1.0 + 0.1 * jax.random.normal(keys[5], (C2,), dtype=jnp.float32))

    # Fold eval-mode BN into per-channel scale / shift.
    scale = gamma / jnp.sqrt(r_var + eps)
    shift = beta - r_mean * scale

    # Kernel-layout weight: (C1, C2, 2, 2) -> (C1, kh, kw, C2) -> (C1, 4*C2).
    w_mat = jnp.transpose(w_iohw, (0, 2, 3, 1)).reshape(C1, 4 * C2)

    out = conv_transpose_forward(x, w_mat, scale, shift)
    out = jax.block_until_ready(out)

    ref = conv_transpose_reference(x, w_iohw, scale, shift)
    assert out.shape == (N, C2, 2 * H, 2 * W), out.shape
    max_err = float(jnp.max(jnp.abs(out - ref)))
    assert jnp.allclose(out, ref, atol=1e-4, rtol=1e-4), max_err

    # TODO(synk): bn=False / act=nn.Identity variants just drop the scale/shift
    # or the sigmoid term; only the default (bn=True, act=SiLU) path is wired up.
    print("KERNEL_OK")
</pallas_src>

<mosaic_0001>
module attributes {stable_mosaic.version = 11 : i64} {
  func.func @_deconv_bn_silu_kernel(%arg0: i32, %arg1: memref<256x4xf32, #tpu.memory_space<vmem>>, %arg2: memref<4x32xf32, #tpu.memory_space<vmem>>, %arg3: memref<1x32xf32, #tpu.memory_space<vmem>>, %arg4: memref<1x32xf32, #tpu.memory_space<vmem>>, %arg5: memref<256x32xf32, #tpu.memory_space<vmem>>) attributes {dimension_semantics = [#tpu.dimension_semantics<parallel>], iteration_bounds = array<i64: 2>, scalar_prefetch = 0 : i64, scratch_operands = 0 : i64, tpu.core_type = #tpu.core_type<tc>, window_params = [{transform_indices = @transform_0, window_bounds = array<i64: 256, 4>}, {pipeline_mode = #tpu.pipeline_mode<synchronous>, transform_indices = @transform_1, window_bounds = array<i64: 4, 32>}, {pipeline_mode = #tpu.pipeline_mode<synchronous>, transform_indices = @transform_2, window_bounds = array<i64: 1, 32>}, {pipeline_mode = #tpu.pipeline_mode<synchronous>, transform_indices = @transform_3, window_bounds = array<i64: 1, 32>}, {transform_indices = @transform_4, window_bounds = array<i64: 256, 32>}]} {
    %c0 = arith.constant 0 : index
    %c0_0 = arith.constant 0 : index
    %0 = vector.load %arg1[%c0, %c0_0] : memref<256x4xf32, #tpu.memory_space<vmem>>, vector<256x4xf32>
    %c0_1 = arith.constant 0 : index
    %c0_2 = arith.constant 0 : index
    %1 = vector.load %arg2[%c0_1, %c0_2] : memref<4x32xf32, #tpu.memory_space<vmem>>, vector<4x32xf32>
    %2 = vector.extract_strided_slice %0 {offsets = [0, 0], sizes = [256, 1], strides = [1, 1]} : vector<256x4xf32> to vector<256x1xf32>
    %3 = vector.extract_strided_slice %1 {offsets = [0, 0], sizes = [1, 32], strides = [1, 1]} : vector<4x32xf32> to vector<1x32xf32>
    %4 = vector.broadcast %2 : vector<256x1xf32> to vector<256x32xf32>
    %5 = vector.broadcast %3 : vector<1x32xf32> to vector<256x32xf32>
    %6 = arith.mulf %4, %5 : vector<256x32xf32>
    %7 = vector.extract_strided_slice %0 {offsets = [0, 1], sizes = [256, 1], strides = [1, 1]} : vector<256x4xf32> to vector<256x1xf32>
    %8 = vector.extract_strided_slice %1 {offsets = [1, 0], sizes = [1, 32], strides = [1, 1]} : vector<4x32xf32> to vector<1x32xf32>
    %9 = vector.broadcast %7 : vector<256x1xf32> to vector<256x32xf32>
    %10 = vector.broadcast %8 : vector<1x32xf32> to vector<256x32xf32>
    %11 = arith.mulf %9, %10 : vector<256x32xf32>
    %12 = arith.addf %6, %11 : vector<256x32xf32>
    %13 = vector.extract_strided_slice %0 {offsets = [0, 2], sizes = [256, 1], strides = [1, 1]} : vector<256x4xf32> to vector<256x1xf32>
    %14 = vector.extract_strided_slice %1 {offsets = [2, 0], sizes = [1, 32], strides = [1, 1]} : vector<4x32xf32> to vector<1x32xf32>
    %15 = vector.broadcast %13 : vector<256x1xf32> to vector<256x32xf32>
    %16 = vector.broadcast %14 : vector<1x32xf32> to vector<256x32xf32>
    %17 = arith.mulf %15, %16 : vector<256x32xf32>
    %18 = arith.addf %12, %17 : vector<256x32xf32>
    %19 = vector.extract_strided_slice %0 {offsets = [0, 3], sizes = [256, 1], strides = [1, 1]} : vector<256x4xf32> to vector<256x1xf32>
    %20 = vector.extract_strided_slice %1 {offsets = [3, 0], sizes = [1, 32], strides = [1, 1]} : vector<4x32xf32> to vector<1x32xf32>
    %21 = vector.broadcast %19 : vector<256x1xf32> to vector<256x32xf32>
    %22 = vector.broadcast %20 : vector<1x32xf32> to vector<256x32xf32>
    %23 = arith.mulf %21, %22 : vector<256x32xf32>
    %24 = arith.addf %18, %23 : vector<256x32xf32>
    %c0_3 = arith.constant 0 : index
    %c0_4 = arith.constant 0 : index
    %25 = vector.load %arg3[%c0_3, %c0_4] : memref<1x32xf32, #tpu.memory_space<vmem>>, vector<1x32xf32>
    %26 = vector.broadcast %25 : vector<1x32xf32> to vector<256x32xf32>
    %27 = arith.mulf %24, %26 : vector<256x32xf32>
    %c0_5 = arith.constant 0 : index
    %c0_6 = arith.constant 0 : index
    %28 = vector.load %arg4[%c0_5, %c0_6] : memref<1x32xf32, #tpu.memory_space<vmem>>, vector<1x32xf32>
    %29 = vector.broadcast %28 : vector<1x32xf32> to vector<256x32xf32>
    %30 = arith.addf %27, %29 : vector<256x32xf32>
    %cst = arith.constant 0.000000e+00 : f32
    %31 = vector.broadcast %cst : f32 to vector<256x32xf32>
    %32 = arith.subf %31, %30 : vector<256x32xf32>
    %33 = math.exp %32 : vector<256x32xf32>
    %cst_7 = arith.constant 1.000000e+00 : f32
    %34 = vector.broadcast %cst_7 : f32 to vector<256x32xf32>
    %35 = arith.addf %34, %33 : vector<256x32xf32>
    %cst_8 = arith.constant 1.000000e+00 : f32
    %36 = vector.broadcast %cst_8 : f32 to vector<256x32xf32>
    %37 = arith.divf %36, %35 : vector<256x32xf32>
    %38 = arith.mulf %30, %37 : vector<256x32xf32>
    %c0_9 = arith.constant 0 : index
    %c0_10 = arith.constant 0 : index
    %39 = vector.load %arg5[%c0_9, %c0_10] : memref<256x32xf32, #tpu.memory_space<vmem>>, vector<256x32xf32>
    tpu.vector_store %arg5[%c0_9, %c0_10], %38 {strides = array<i32>} : memref<256x32xf32, #tpu.memory_space<vmem>>, vector<256x32xf32>,
    return
  }
  func.func @transform_0(%arg0: i32) -> (i32, i32) {
    %c0_i32 = arith.constant 0 : i32
    %c0_i32_0 = arith.constant 0 : i32
    return %arg0, %c0_i32 : i32, i32
  }
  func.func @transform_1(%arg0: i32) -> (i32, i32) {
    %c0_i32 = arith.constant 0 : i32
    %c0_i32_0 = arith.constant 0 : i32
    %c0_i32_1 = arith.constant 0 : i32
    return %c0_i32, %c0_i32_0 : i32, i32
  }
  func.func @transform_2(%arg0: i32) -> (i32, i32) {
    %c0_i32 = arith.constant 0 : i32
    %c0_i32_0 = arith.constant 0 : i32
    %c0_i32_1 = arith.constant 0 : i32
    return %c0_i32, %c0_i32_0 : i32, i32
  }
  func.func @transform_3(%arg0: i32) -> (i32, i32) {
    %c0_i32 = arith.constant 0 : i32
    %c0_i32_0 = arith.constant 0 : i32
    %c0_i32_1 = arith.constant 0 : i32
    return %c0_i32, %c0_i32_0 : i32, i32
  }
  func.func @transform_4(%arg0: i32) -> (i32, i32) {
    %c0_i32 = arith.constant 0 : i32
    %c0_i32_0 = arith.constant 0 : i32
    return %arg0, %c0_i32 : i32, i32
  }
}

</mosaic_0001>

<bundles_post_ra>
// kernel: tile.14
= control target key start
LH: loop header
LB: loop body
LE: loop exit
PB: predicated region body
PF: predicated region fallthrough
CT: control target
= control target key end

     0   :  { %s37_s8 = smov 8   ;;  %s38_s9 = smov 16   ;;  %vm7_vm0 = vcmask 64512   ;;  %vm13_vm1 = vcmask 261312   ;;  %vm19_vm2 = vcmask 195712   ;;  %vm25_vm3 = vcmask 130112   ;;  %s55_s0 = inlined_call_operand.vmem [shape: f32[4,8], index: 0, kind: input, shape index: {}]   ;;  %s56_s1 = inlined_call_operand.vmem [shape: f32[1,32], index: 1, kind: output, shape index: {}]  }
   0x1   :  { %v4_v0 = vld [vmem:[%s55_s0] sm:$0xf]  ;;  %s36_s0 = smov 24  }
   0x2   :  { %5 = vst [vmem:[#allocation1] sm:$0xf] %v4_v0 }
   0x9   :  { %v10_v1 = vld [vmem:[#allocation1 + $0x3] sm:$0x1]   ;;  %v22_v2 = vld [vmem:[#allocation1 + $0x1] sm:$0x1]   ;;  %v16_v3 = vld [vmem:[#allocation1 + $0x2] sm:$0x1]  }
   0xa   :  { %11 = vrot.lane.b32.xlu0 %v10_v1, %s36_s0  ;;  %23 = vrot.lane.b32.xlu1 %v22_v2, %s37_s8  ;;  %v6_v4 = vld [vmem:[#allocation1] sm:$0x1]  }
   0xb   :  { %8 = vst.msk [vmem:[#allocation0] sm:$0x1] %vm7_vm0, %v6_v4  }
  0x12   :  { %17 = vrot.lane.b32.xlu0 %v16_v3, %s38_s9 }
  0x7c   :  { %v12_v5 = vpop.permute.xlu0 %11   ;;  %v24_v6 = vpop.permute.xlu1 %23  }
  0x7d   :  { %14 = vst.msk [vmem:[#allocation0] sm:$0x1] %vm13_vm1, %v12_v5  }
  0x84   :  { %v18_v7 = vpop.permute.xlu0 %17  }
  0x85   :  { %20 = vst.msk [vmem:[#allocation0] sm:$0x1] %vm19_vm2, %v18_v7  }
  0x86   :  { %26 = vst.msk [vmem:[#allocation0] sm:$0x1] %vm25_vm3, %v24_v6  }
  0x8d   :  { %v29_v8 = vld [vmem:[#allocation0] sm:$0x1] }
  0x8e   :  { %32 = vst [vmem:[%s56_s1] sm:$0x1] %v29_v8 }

// kernel: tile.13
= control target key start
LH: loop header
LB: loop body
LE: loop exit
PB: predicated region body
PF: predicated region fallthrough
CT: control target
= control target key end

     0   :  { %s22_s0 = inlined_call_operand.vmem [shape: f32[8], index: 0, kind: input, shape index: {}]   ;;  %s23_s1 = inlined_call_operand.vmem [shape: f32[4,8], index: 1, kind: output, shape index: {}]  }
   0x1   :  { %v4_v0 = vld [vmem:[%s22_s0] ss:$0 sm:$0xff] }
   0x2   :  { %5 = vst [vmem:[%s23_s1] sm:$0xf] %v4_v0 }

// kernel: conv_transpose_forward.1
= control target key start
LH: loop header
LB: loop body
LE: loop exit
PB: predicated region body
PF: predicated region fallthrough
CT: control target
= control target key end

     0   :  { %s2011_s15 = smov 0   ;;  %s3339_s0 = inlined_call_operand.vmem [shape: f32[512,4], index: 0, kind: input, shape index: {}]   ;;  %s3340_s1 = inlined_call_operand.vmem [shape: f32[4,32], index: 1, kind: input, shape index: {}]   ;;  %s3341_s2 = inlined_call_operand.vmem [shape: f32[1,32], index: 2, kind: input, shape index: {}]   ;;  %s3342_s3 = inlined_call_operand.vmem [shape: f32[1,32], index: 3, kind: input, shape index: {}]   ;;  %s3343_s4 = inlined_call_operand.vmem [shape: f32[512,32], index: 4, kind: output, shape index: {}]  }
   0x1 LB: > { %s1807_s16 = sadd.s32 4294967295, %s1980_s15   ;;  %p1811_p0 = scmp.ge.s32.totalorder %s1980_s15, 1  ;;  %s1980_s15 = sphi %s2011_s15, %s14_s15  }
   0x2   : > { %p163_p1 = scmp.lt.s32.totalorder %s1980_s15, 3 }
   0x4   : > { %p164_p2 = pnand %p1811_p0, %p163_p1 }
   0x6   : > { %167 = sbr.rel (%p164_p2) target bundleno = 579 (0x243), region = 36 }
   0xb   : > { %s1812_s17 = sshll.u32 %s1807_s16, 5  ;;  %v1982_v0 = vmov 0   ;;  %v1983_v33 = vmov 1   ;;  %v2235_v58 = vld [vmem:[%s3340_s1] sm:$0xf]  ;;  %v1984_v61 = vmov 2  }
   0xc   : > { %1832 = vset.pattern.permute.xlu2 %v1982_v0  ;;  %1831 = vset.pattern.permute.xlu1 %v1982_v0  ;;  %p190_p3 = scmp.lt.s32.totalorder %s1812_s17, 63  ;;  %3372 = vst [vmem:[#allocation15_spill] sm:$0xff] %v2235_v58  ;;  %v2238_v59 = vperm.slane %v2235_v58, 1  ;;  %v2242_v60 = vperm.slane %v2235_v58, 0  ;;  %vm1718_vm4 = vcmask 261120  }
   0xd   : > { %1830 = vset.pattern.permute.xlu0 %v1982_v0 }
   0xe   : > { %s3442_s17 = smov (!%p190_p3, %s1812_s17), 63 }
   0xf   : > { %s1813_s18 = sshll.u32 %s3442_s17, 3 }
  0x10   : > { %s2027_s21 = scalar_lea.vmem %s3339_s0, %s1813_s18  ;;  %s2686_s30 = scalar_lea.vmem %s3343_s4, %s1813_s18 }
  0x11   : > { %v2030_v1 = vld [vmem:[%s2027_s21 + $0x20] sm:$0xff]  ;;  %v2033_v2 = vld [vmem:[%s2027_s21 + $0x10] sm:$0xff]  ;;  %v2042_v4 = vld [vmem:[%s2027_s21 + $0x28] sm:$0xff] }
  0x12   : > { %v2036_v3 = vld [vmem:[%s2027_s21] sm:$0xff]  ;;  %256 = vperm.xlu2 %1832, %v2030_v1   ;;  %246 = vperm.xlu1 %1831, %v2033_v2   ;;  %3360 = vst [vmem:[#allocation3_spill] sm:$0xff] %v2042_v4  ;;  %v2045_v5 = vld [vmem:[%s2027_s21 + $0x18] sm:$0xff]  ;;  %v2048_v6 = vld [vmem:[%s2027_s21 + $0x8] sm:$0xff] }
  0x13   : > { %3359 = vst [vmem:[#allocation2_spill] sm:$0xff] %v2036_v3  ;;  %236 = vperm.xlu0 %1830, %v2036_v3   ;;  %v2054_v7 = vld [vmem:[%s2027_s21 + $0x40] sm:$0xff]  ;;  %v2057_v8 = vld [vmem:[%s2027_s21 + $0x38] sm:$0xff]  ;;  %v2060_v9 = vld [vmem:[%s2027_s21 + $0x30] sm:$0xff] }
  0x14   : > { %3361 = vst [vmem:[#allocation4_spill] sm:$0xff] %v2045_v5  ;;  %v2066_v10 = vld [vmem:[%s2027_s21 + $0x58] sm:$0xff]  ;;  %v2069_v11 = vld [vmem:[%s2027_s21 + $0x50] sm:$0xff]  ;;  %v2072_v12 = vld [vmem:[%s2027_s21 + $0x48] sm:$0xff] }
  0x15   : > { %3362 = vst [vmem:[#allocation5_spill] sm:$0xff] %v2048_v6  ;;  %v2078_v13 = vld [vmem:[%s2027_s21 + $0x70] sm:$0xff]  ;;  %v2081_v14 = vld [vmem:[%s2027_s21 + $0x68] sm:$0xff]  ;;  %v2084_v15 = vld [vmem:[%s2027_s21 + $0x60] sm:$0xff] }
  0x16   : > { %3363 = vst [vmem:[#allocation6_spill] sm:$0xff] %v2054_v7  ;;  %v2090_v16 = vld [vmem:[%s2027_s21 + $0x88] sm:$0xff]  ;;  %v2093_v17 = vld [vmem:[%s2027_s21 + $0x80] sm:$0xff]  ;;  %v2096_v18 = vld [vmem:[%s2027_s21 + $0x78] sm:$0xff] }
  0x17   : > { %3364 = vst [vmem:[#allocation7_spill] sm:$0xff] %v2066_v10  ;;  %v2102_v19 = vld [vmem:[%s2027_s21 + $0xa0] sm:$0xff]  ;;  %v2105_v20 = vld [vmem:[%s2027_s21 + $0x98] sm:$0xff]  ;;  %v2108_v21 = vld [vmem:[%s2027_s21 + $0x90] sm:$0xff] }
  0x18   : > { %3365 = vst [vmem:[#allocation8_spill] sm:$0xff] %v2069_v11  ;;  %v2114_v22 = vld [vmem:[%s2027_s21 + $0xb8] sm:$0xff]  ;;  %v2117_v23 = vld [vmem:[%s2027_s21 + $0xb0] sm:$0xff]  ;;  %v2120_v24 = vld [vmem:[%s2027_s21 + $0xa8] sm:$0xff] }
  0x19   : > { %v2126_v25 = vld [vmem:[%s2027_s21 + $0xd0] sm:$0xff]  ;;  %v2129_v26 = vld [vmem:[%s2027_s21 + $0xc8] sm:$0xff]  ;;  %v2132_v27 = vld [vmem:[%s2027_s21 + $0xc0] sm:$0xff] }
  0x1a   : > { %261 = vperm.xlu2 %1832, %v2042_v4   ;;  %251 = vperm.xlu1 %1831, %v2045_v5   ;;  %3366 = vst [vmem:[#allocation9_spill] sm:$0xff] %v2126_v25  ;;  %v2138_v28 = vld [vmem:[%s2027_s21 + $0xe8] sm:$0xff]  ;;  %v2141_v29 = vld [vmem:[%s2027_s21 + $0xe0] sm:$0xff]  ;;  %v2144_v30 = vld [vmem:[%s2027_s21 + $0xd8] sm:$0xff] }
  0x1b   : > { %241 = vperm.xlu0 %1830, %v2048_v6   ;;  %3367 = vst [vmem:[#allocation10_spill] sm:$0xff] %v2129_v26  ;;  %v2150_v31 = vld [vmem:[%s2027_s21 + $0xf8] sm:$0xff]  ;;  %v2153_v32 = vld [vmem:[%s2027_s21 + $0xf0] sm:$0xff] }
  0x1c   : > { %3368 = vst [vmem:[#allocation11_spill] sm:$0xff] %v2138_v28 }
  0x1d   : > { %3369 = vst [vmem:[#allocation12_spill] sm:$0xff] %v2141_v29 }
  0x1e   : > { %3370 = vst [vmem:[#allocation13_spill] sm:$0xff] %v2150_v31 }
  0x22   : > { %276 = vperm.xlu2 %1832, %v2054_v7   ;;  %271 = vperm.xlu1 %1831, %v2057_v8  }
  0x23   : > { %266 = vperm.xlu0 %1830, %v2060_v9  }
  0x2a   : > { %291 = vperm.xlu2 %1832, %v2066_v10   ;;  %286 = vperm.xlu1 %1831, %v2069_v11  }
  0x2b   : > { %281 = vperm.xlu0 %1830, %v2072_v12  }
  0x32   : > { %306 = vperm.xlu2 %1832, %v2078_v13   ;;  %301 = vperm.xlu1 %1831, %v2081_v14  }
  0x33   : > { %296 = vperm.xlu0 %1830, %v2084_v15  }
  0x3a   : > { %321 = vperm.xlu2 %1832, %v2090_v16   ;;  %316 = vperm.xlu1 %1831, %v2093_v17  }
  0x3b   : > { %311 = vperm.xlu0 %1830, %v2096_v18  }
  0x42   : > { %336 = vperm.xlu2 %1832, %v2102_v19   ;;  %331 = vperm.xlu1 %1831, %v2105_v20  }
  0x43   : > { %326 = vperm.xlu0 %1830, %v2108_v21  }
  0x4a   : > { %351 = vperm.xlu2 %1832, %v2114_v22   ;;  %346 = vperm.xlu1 %1831, %v2117_v23  }
  0x4b   : > { %341 = vperm.xlu0 %1830, %v2120_v24  }
  0x52   : > { %366 = vperm.xlu2 %1832, %v2126_v25   ;;  %361 = vperm.xlu1 %1831, %v2129_v26  }
  0x53   : > { %356 = vperm.xlu0 %1830, %v2132_v27  }
  0x5a   : > { %381 = vperm.xlu2 %1832, %v2138_v28   ;;  %376 = vperm.xlu1 %1831, %v2141_v29  }
  0x5b   : > { %371 = vperm.xlu0 %1830, %v2144_v30  }
  0x62   : > { %1833 = vset.pattern.permute.xlu2 %v1983_v33  ;;  %391 = vperm.xlu1 %1831, %v2150_v31  }
  0x63   : > { %386 = vperm.xlu0 %1830, %v2153_v32   ;;  %428 = vperm.xlu2 %1833, %v2036_v3  }
  0x6a   : > { %1835 = vset.pattern.permute.xlu1 %v1983_v33 }
  0x6b   : > { %1834 = vset.pattern.permute.xlu0 %v1983_v33  ;;  %436 = vperm.xlu1 %1835, %v2033_v2  }
  0x6c   : > { %440 = vperm.xlu2 %1833, %v2045_v5   ;;  %432 = vperm.xlu0 %1834, %v2048_v6   ;;  %v2161_v34 = vpop.permute.xlu2 %256 }
  0x73   : > { %444 = vperm.xlu1 %1835, %v2030_v1  }
  0x74   : > { %448 = vperm.xlu2 %1833, %v2042_v4   ;;  %452 = vperm.xlu0 %1834, %v2060_v9   ;;  %v2166_v35 = vpop.permute.xlu2 %261 }
  0x7b   : > { %456 = vperm.xlu1 %1835, %v2057_v8  }
  0x7c   : > { %460 = vperm.xlu2 %1833, %v2054_v7   ;;  %464 = vperm.xlu0 %1834, %v2072_v12   ;;  %v2171_v36 = vpop.permute.xlu2 %276 }
  0x83   : > { %468 = vperm.xlu1 %1835, %v2069_v11  }
  0x84   : > { %472 = vperm.xlu2 %1833, %v2066_v10   ;;  %476 = vperm.xlu0 %1834, %v2084_v15   ;;  %v2176_v37 = vpop.permute.xlu2 %291  ;;  %v2178_v38 = vpop.permute.xlu1 %246 }
  0x85   : > { %v237_v39 = vpop.permute.xlu0 %236 }
  0x86   : > { %v395_v33 = vmul.f32 %v2242_v60, %v237_v39 }
  0x8b   : > { %480 = vperm.xlu1 %1835, %v2081_v14  }
  0x8c   : > { %484 = vperm.xlu2 %1833, %v2078_v13   ;;  %488 = vperm.xlu0 %1834, %v2096_v18   ;;  %v2183_v40 = vpop.permute.xlu2 %306  ;;  %v252_v41 = vpop.permute.xlu1 %251 }
  0x8d   : > { %v2185_v42 = vpop.permute.xlu0 %241 }
  0x93   : > { %492 = vperm.xlu1 %1835, %v2093_v17  }
  0x94   : > { %496 = vperm.xlu2 %1833, %v2090_v16   ;;  %500 = vperm.xlu0 %1834, %v2108_v21   ;;  %v2190_v43 = vpop.permute.xlu2 %321  ;;  %v2192_v44 = vpop.permute.xlu1 %271 }
  0x95   : > { %v2194_v45 = vpop.permute.xlu0 %266 }
  0x9b   : > { %504 = vperm.xlu1 %1835, %v2105_v20  }
  0x9c   : > { %508 = vperm.xlu2 %1833, %v2102_v19   ;;  %512 = vperm.xlu0 %1834, %v2120_v24   ;;  %v2199_v46 = vpop.permute.xlu2 %336  ;;  %v2201_v47 = vpop.permute.xlu1 %286 }
  0x9d   : > { %v2203_v48 = vpop.permute.xlu0 %281 }
  0xa3   : > { %516 = vperm.xlu1 %1835, %v2117_v23  }
  0xa4   : > { %520 = vperm.xlu2 %1833, %v2114_v22   ;;  %524 = vperm.xlu0 %1834, %v2132_v27   ;;  %v2208_v49 = vpop.permute.xlu2 %351  ;;  %v2210_v50 = vpop.permute.xlu1 %301 }
  0xa5   : > { %v2212_v51 = vpop.permute.xlu0 %296 }
  0xab   : > { %528 = vperm.xlu1 %1835, %v2129_v26  }
  0xac   : > { %532 = vperm.xlu2 %1833, %v2126_v25   ;;  %536 = vperm.xlu0 %1834, %v2144_v30   ;;  %v2217_v52 = vpop.permute.xlu2 %366  ;;  %v2219_v53 = vpop.permute.xlu1 %316 }
  0xad   : > { %v2221_v54 = vpop.permute.xlu0 %311 }
  0xb3   : > { %540 = vperm.xlu1 %1835, %v2141_v29  }
  0xb4   : > { %544 = vperm.xlu2 %1833, %v2138_v28   ;;  %548 = vperm.xlu0 %1834, %v2153_v32   ;;  %v2226_v55 = vpop.permute.xlu2 %381  ;;  %v2228_v56 = vpop.permute.xlu1 %331 }
  0xb5   : > { %3371 = vst [vmem:[#allocation14_spill] sm:$0xff] %v2226_v55  ;;  %v2230_v57 = vpop.permute.xlu0 %326 }
  0xbb   : > { %552 = vperm.xlu1 %1835, %v2150_v31  }
  0xbc   : > { %1836 = vset.pattern.permute.xlu2 %v1984_v61  ;;  %1837 = vset.pattern.permute.xlu0 %v1984_v61  ;;  %v2244_v62 = vpop.permute.xlu1 %346 }
  0xbd   : > { %3373 = vst [vmem:[#allocation16_spill] sm:$0xff] %v2244_v62  ;;  %621 = vperm.xlu2 %1836, %v2036_v3   ;;  %625 = vperm.xlu0 %1837, %v2048_v6   ;;  %v2248_v63 = vpop.permute.xlu0 %341  ;;  %v429_v0 = vpop.permute.xlu2 %428 }
  0xbe   : > { %3374 = vst [vmem:[#allocation17_spill] sm:$0xff] %v2248_v63  ;;  %v556_v55 = vmul.f32 %v2238_v59, %v429_v0  ;;  %v398_v63 = vmul.f32 %v2242_v60, %v252_v41 }
  0xc0   : > { %v2252_v31 = vadd.f32 %v556_v55, %v395_v33  ;;  %v400_v33 = vmul.f32 %v2242_v60, %v2166_v35 }
  0xc3   : > { %1838 = vset.pattern.permute.xlu1 %v1984_v61 }
  0xc4   : > { %629 = vperm.xlu1 %1838, %v2033_v2   ;;  %v2255_v58 = vpop.permute.xlu1 %361 }
  0xc5   : > { %633 = vperm.xlu2 %1836, %v2045_v5   ;;  %645 = vperm.xlu0 %1837, %v2060_v9   ;;  %v2259_v3 = vpop.permute.xlu0 %356 }
  0xc6   : > { %v441_v62 = vpop.permute.xlu2 %440 }
  0xc7   : > { %v559_v39 = vmul.f32 %v2238_v59, %v441_v62 }
  0xc9   : > { %v2263_v6 = vadd.f32 %v559_v39, %v398_v63 }
  0xcc   : > { %637 = vperm.xlu1 %1838, %v2030_v1   ;;  %v2266_v55 = vpop.permute.xlu1 %376 }
  0xcd   : > { %3375 = vst [vmem:[#allocation18_spill] sm:$0xff] %v2266_v55  ;;  %641 = vperm.xlu2 %1836, %v2042_v4   ;;  %657 = vperm.xlu0 %1837, %v2072_v12   ;;  %v2270_v61 = vpop.permute.xlu0 %371  ;;  %v403_v4 = vmul.f32 %v2242_v60, %v2171_v36  ;;  %v406_v36 = vmul.f32 %v2242_v60, %v2176_v37 }
  0xce   : > { %v449_v0 = vpop.permute.xlu2 %448 }
  0xcf   : > { %v561_v41 = vmul.f32 %v2238_v59, %v449_v0 }
  0xd1   : > { %v2275_v5 = vadd.f32 %v561_v41, %v400_v33  ;;  %v397_v33 = vmul.f32 %v2242_v60, %v2178_v38  ;;  %v399_v38 = vmul.f32 %v2242_v60, %v2161_v34 }
  0xd4   : > { %649 = vperm.xlu1 %1838, %v2057_v8   ;;  %v2278_v62 = vpop.permute.xlu1 %391 }
  0xd5   : > { %3376 = vst [vmem:[#allocation19_spill] sm:$0xff] %v2278_v62  ;;  %653 = vperm.xlu2 %1836, %v2054_v7   ;;  %669 = vperm.xlu0 %1837, %v2084_v15   ;;  %v2282_v63 = vpop.permute.xlu0 %386 }
  0xd6   : > { %v461_v39 = vpop.permute.xlu2 %460 }
  0xd7   : > { %v564_v35 = vmul.f32 %v2238_v59, %v461_v39 }
  0xd9   : > { %v2287_v55 = vadd.f32 %v564_v35, %v403_v4  ;;  %v396_v4 = vmul.f32 %v2242_v60, %v2185_v42 }
  0xdb   : > { %3377 = vst [vmem:[#allocation20_spill] sm:$0xff] %v2287_v55 }
  0xdc   : > { %661 = vperm.xlu1 %1838, %v2069_v11  }
  0xdd   : > { %665 = vperm.xlu2 %1836, %v2066_v10   ;;  %681 = vperm.xlu0 %1837, %v2096_v18   ;;  %v437_v0 = vpop.permute.xlu1 %436 }
  0xde   : > { %v558_v41 = vmul.f32 %v2238_v59, %v437_v0  ;;  %v473_v7 = vpop.permute.xlu2 %472  ;;  %v433_v62 = vpop.permute.xlu0 %432  ;;  %v409_v0 = vmul.f32 %v2242_v60, %v2183_v40  ;;  %v402_v40 = vmul.f32 %v2242_v60, %v2192_v44  ;;  %v405_v44 = vmul.f32 %v2242_v60, %v2201_v47 }
  0xdf   : > { %v567_v39 = vmul.f32 %v2238_v59, %v473_v7  ;;  %v557_v35 = vmul.f32 %v2238_v59, %v433_v62  ;;  %v408_v47 = vmul.f32 %v2242_v60, %v2210_v50  ;;  %v411_v50 = vmul.f32 %v2242_v60, %v2219_v53 }
  0xe0   : > { %v2301_v10 = vadd.f32 %v558_v41, %v397_v33  ;;  %v401_v33 = vmul.f32 %v2242_v60, %v2194_v45  ;;  %v1985_v53 = vmov 3  }
  0xe1   : > { %v2303_v11 = vadd.f32 %v567_v39, %v406_v36  ;;  %v2305_v55 = vadd.f32 %v557_v35, %v396_v4 }
  0xe4   : > { %673 = vperm.xlu1 %1838, %v2081_v14  }
  0xe5   : > { %677 = vperm.xlu2 %1836, %v2078_v13   ;;  %693 = vperm.xlu0 %1837, %v2108_v21   ;;  %v445_v37 = vpop.permute.xlu1 %444 }
  0xe6   : > { %v560_v7 = vmul.f32 %v2238_v59, %v445_v37  ;;  %v485_v42 = vpop.permute.xlu2 %484  ;;  %v453_v62 = vpop.permute.xlu0 %452 }
  0xe7   : > { %v570_v41 = vmul.f32 %v2238_v59, %v485_v42  ;;  %v562_v36 = vmul.f32 %v2238_v59, %v453_v62 }
  0xe8   : > { %v2319_v4 = vadd.f32 %v560_v7, %v399_v38  ;;  %v412_v38 = vmul.f32 %v2242_v60, %v2190_v43  ;;  %v404_v7 = vmul.f32 %v2242_v60, %v2203_v48 }
  0xe9   : > { %v2321_v39 = vadd.f32 %v570_v41, %v409_v0  ;;  %v2323_v35 = vadd.f32 %v562_v36, %v401_v33 }
  0xec   : > { %685 = vperm.xlu1 %1838, %v2093_v17  }
  0xed   : > { %689 = vperm.xlu2 %1836, %v2090_v16   ;;  %705 = vperm.xlu0 %1837, %v2120_v24   ;;  %v457_v34 = vpop.permute.xlu1 %456 }
  0xee   : > { %v563_v45 = vmul.f32 %v2238_v59, %v457_v34  ;;  %v497_v37 = vpop.permute.xlu2 %496  ;;  %v465_v42 = vpop.permute.xlu0 %464 }
  0xef   : > { %v573_v62 = vmul.f32 %v2238_v59, %v497_v37  ;;  %v565_v0 = vmul.f32 %v2238_v59, %v465_v42 }
  0xf0   : > { %v2337_v33 = vadd.f32 %v563_v45, %v402_v40  ;;  %v415_v40 = vmul.f32 %v2242_v60, %v2199_v46  ;;  %v407_v45 = vmul.f32 %v2242_v60, %v2212_v51 }
  0xf1   : > { %v2339_v41 = vadd.f32 %v573_v62, %v412_v38  ;;  %v2341_v36 = vadd.f32 %v565_v0, %v404_v7 }
  0xf4   : > { %697 = vperm.xlu1 %1838, %v2105_v20  }
  0xf5   : > { %701 = vperm.xlu2 %1836, %v2102_v19   ;;  %717 = vperm.xlu0 %1837, %v2132_v27   ;;  %v469_v43 = vpop.permute.xlu1 %468 }
  0xf6   : > { %v566_v48 = vmul.f32 %v2238_v59, %v469_v43  ;;  %v509_v34 = vpop.permute.xlu2 %508  ;;  %v477_v37 = vpop.permute.xlu0 %476 }
  0xf7   : > { %v576_v42 = vmul.f32 %v2238_v59, %v509_v34  ;;  %v568_v38 = vmul.f32 %v2238_v59, %v477_v37 }
  0xf8   : > { %v2355_v7 = vadd.f32 %v566_v48, %v405_v44  ;;  %v418_v44 = vmul.f32 %v2242_v60, %v2208_v49  ;;  %v410_v48 = vmul.f32 %v2242_v60, %v2221_v54 }
  0xf9   : > { %v2357_v62 = vadd.f32 %v576_v42, %v415_v40  ;;  %v2359_v0 = vadd.f32 %v568_v38, %v407_v45 }
  0xfc   : > { %709 = vperm.xlu1 %1838, %v2117_v23  }
  0xfd   : > { %713 = vperm.xlu2 %1836, %v2114_v22   ;;  %729 = vperm.xlu0 %1837, %v2144_v30   ;;  %v481_v46 = vpop.permute.xlu1 %480 }
  0xfe   : > { %v569_v51 = vmul.f32 %v2238_v59, %v481_v46  ;;  %v521_v43 = vpop.permute.xlu2 %520  ;;  %v489_v34 = vpop.permute.xlu0 %488 }
  0xff   : > { %v579_v37 = vmul.f32 %v2238_v59, %v521_v43  ;;  %v571_v40 = vmul.f32 %v2238_v59, %v489_v34 }
 0x100   : > { %v2373_v45 = vadd.f32 %v569_v51, %v408_v47  ;;  %v421_v47 = vmul.f32 %v2242_v60, %v2217_v52  ;;  %v413_v51 = vmul.f32 %v2242_v60, %v2230_v57  ;;  %v414_v57 = vmul.f32 %v2242_v60, %v2228_v56 }
 0x101   : > { %v2375_v42 = vadd.f32 %v579_v37, %v418_v44  ;;  %v2377_v38 = vadd.f32 %v571_v40, %v410_v48 }
 0x104   : > { %721 = vperm.xlu1 %1838, %v2129_v26   ;;  %v3386_v26 = vld [vmem:[#allocation2_spill] sm:$0xff] }
 0x105   : > { %725 = vperm.xlu2 %1836, %v2126_v25   ;;  %741 = vperm.xlu0 %1837, %v2153_v32   ;;  %v493_v49 = vpop.permute.xlu1 %492  ;;  %v3385_v25 = vld [vmem:[#allocation16_spill] sm:$0xff] }
 0x106   : > { %v572_v54 = vmul.f32 %v2238_v59, %v493_v49  ;;  %v533_v46 = vpop.permute.xlu2 %532  ;;  %v501_v43 = vpop.permute.xlu0 %500 }
 0x107   : > { %v582_v34 = vmul.f32 %v2238_v59, %v533_v46  ;;  %v574_v44 = vmul.f32 %v2238_v59, %v501_v43  ;;  %v3380_v43 = vld [vmem:[#allocation5_spill] sm:$0xff] }
 0x108   : > { %v2391_v48 = vadd.f32 %v572_v54, %v411_v50  ;;  %v3381_v54 = vld [vmem:[#allocation14_spill] sm:$0xff] }
 0x109   : > { %v2393_v37 = vadd.f32 %v582_v34, %v421_v47  ;;  %v2395_v40 = vadd.f32 %v574_v44, %v413_v51  ;;  %v424_v47 = vmul.f32 %v2242_v60, %v3381_v54  ;;  %v3382_v51 = vld [vmem:[#allocation17_spill] sm:$0xff] }
 0x10a   : > { %3378 = vst [vmem:[#allocation21_spill] sm:$0xff] %v2391_v48  ;;  %v416_v34 = vmul.f32 %v2242_v60, %v3382_v51  ;;  %v417_v51 = vmul.f32 %v2242_v60, %v3385_v25 }
 0x10b   : > { %3379 = vst [vmem:[#allocation22_spill] sm:$0xff] %v2393_v37 }
 0x10c   : > { %733 = vperm.xlu1 %1838, %v2141_v29  }
 0x10d   : > { %737 = vperm.xlu2 %1836, %v2138_v28   ;;  %1840 = vset.pattern.permute.xlu0 %v1985_v53  ;;  %v505_v52 = vpop.permute.xlu1 %504 }
 0x10e   : > { %v575_v49 = vmul.f32 %v2238_v59, %v505_v52  ;;  %v545_v46 = vpop.permute.xlu2 %544  ;;  %818 = vperm.xlu0 %1840, %v3380_v43   ;;  %v513_v50 = vpop.permute.xlu0 %512  ;;  %v3383_v52 = vld [vmem:[#allocation13_spill] sm:$0xff]  ;;  %v3384_v43 = vld [vmem:[#allocation15_spill] sm:$0xff] }
 0x10f   : > { %v585_v44 = vmul.f32 %v2238_v59, %v545_v46  ;;  %v577_v28 = vmul.f32 %v2238_v59, %v513_v50  ;;  %v2417_v48 = vperm.slane %v3384_v43, 2 }
 0x110   : > { %v2409_v29 = vadd.f32 %v575_v49, %v414_v57 }
 0x111   : > { %v2411_v37 = vadd.f32 %v585_v44, %v424_v47  ;;  %v2413_v56 = vadd.f32 %v577_v28, %v416_v34  ;;  %v419_v28 = vmul.f32 %v2242_v60, %v2259_v3 }
 0x114   : > { %745 = vperm.xlu1 %1838, %v3383_v52  }
 0x115   : > { %1839 = vset.pattern.permute.xlu2 %v1985_v53  ;;  %v517_v54 = vpop.permute.xlu1 %516 }
 0x116   : > { %v578_v46 = vmul.f32 %v2238_v59, %v517_v54  ;;  %814 = vperm.xlu2 %1839, %v3386_v26   ;;  %838 = vperm.xlu0 %1840, %v2060_v9   ;;  %v525_v57 = vpop.permute.xlu0 %524  ;;  %v420_v26 = vmul.f32 %v2242_v60, %v2255_v58  ;;  %v3387_v54 = vld [vmem:[#allocation4_spill] sm:$0xff] }
 0x117   : > { %v580_v49 = vmul.f32 %v2238_v59, %v525_v57  ;;  %v622_v50 = vpop.permute.xlu2 %621 }
 0x118   : > { %v2427_v47 = vadd.f32 %v578_v46, %v417_v51  ;;  %v749_v34 = vmul.f32 %v2417_v48, %v622_v50  ;;  %v422_v46 = vmul.f32 %v2242_v60, %v2270_v61 }
 0x119   : > { %v2430_v44 = vadd.f32 %v580_v49, %v419_v28 }
 0x11a   : > { %v2433_v25 = vadd.f32 %v749_v34, %v2252_v31  ;;  %v3389_v34 = vld [vmem:[#allocation3_spill] sm:$0xff] }
 0x11c   : > { %1841 = vset.pattern.permute.xlu1 %v1985_v53 }
 0x11d   : > { %822 = vperm.xlu1 %1841, %v2033_v2   ;;  %v529_v9 = vpop.permute.xlu1 %528 }
 0x11e   : > { %v581_v3 = vmul.f32 %v2238_v59, %v529_v9  ;;  %826 = vperm.xlu2 %1839, %v3387_v54   ;;  %850 = vperm.xlu0 %1840, %v2072_v12   ;;  %v537_v51 = vpop.permute.xlu0 %536  ;;  %v3388_v12 = vld [vmem:[#allocation18_spill] sm:$0xff] }
 0x11f   : > { %v583_v31 = vmul.f32 %v2238_v59, %v537_v51  ;;  %v634_v57 = vpop.permute.xlu2 %633  ;;  %v423_v50 = vmul.f32 %v2242_v60, %v3388_v12 }
 0x120   : > { %v2444_v53 = vadd.f32 %v581_v3, %v420_v26  ;;  %v752_v2 = vmul.f32 %v2417_v48, %v634_v57  ;;  %v425_v26 = vmul.f32 %v2242_v60, %v2282_v63 }
 0x121   : > { %v2447_v28 = vadd.f32 %v583_v31, %v422_v46 }
 0x122   : > { %v2450_v58 = vadd.f32 %v752_v2, %v2263_v6  ;;  %v3391_v2 = vld [vmem:[#allocation6_spill] sm:$0xff] }
 0x125   : > { %830 = vperm.xlu1 %1841, %v2030_v1   ;;  %v541_v49 = vpop.permute.xlu1 %540 }
 0x126   : > { %v584_v61 = vmul.f32 %v2238_v59, %v541_v49  ;;  %834 = vperm.xlu2 %1839, %v3389_v34   ;;  %862 = vperm.xlu0 %1840, %v2084_v15   ;;  %v549_v9 = vpop.permute.xlu0 %548  ;;  %v3390_v15 = vld [vmem:[#allocation19_spill] sm:$0xff]  ;;  %v3392_v34 = vld [vmem:[#allocation20_spill] sm:$0xff] }
 0x127   : > { %v586_v3 = vmul.f32 %v2238_v59, %v549_v9  ;;  %v642_v6 = vpop.permute.xlu2 %641  ;;  %v426_v57 = vmul.f32 %v2242_v60, %v3390_v15  ;;  %v3393_v60 = vld [vmem:[#allocation8_spill] sm:$0xff] }
 0x128   : > { %v2461_v54 = vadd.f32 %v584_v61, %v423_v50  ;;  %v754_v1 = vmul.f32 %v2417_v48, %v642_v6 }
 0x129   : > { %v2464_v51 = vadd.f32 %v586_v3, %v425_v26 }
 0x12a   : > { %v2467_v46 = vadd.f32 %v754_v1, %v2275_v5 }
 0x12d   : > { %842 = vperm.xlu1 %1841, %v2057_v8   ;;  %v553_v31 = vpop.permute.xlu1 %552 }
 0x12e   : > { %v587_v63 = vmul.f32 %v2238_v59, %v553_v31  ;;  %846 = vperm.xlu2 %1839, %v3391_v2   ;;  %874 = vperm.xlu0 %1840, %v2096_v18   ;;  %v3394_v59 = vld [vmem:[#allocation7_spill] sm:$0xff] }
 0x12f   : > { %v654_v49 = vpop.permute.xlu2 %653  ;;  %v626_v12 = vpop.permute.xlu0 %625 }
 0x130   : > { %v2475_v50 = vadd.f32 %v587_v63, %v426_v57  ;;  %v757_v61 = vmul.f32 %v2417_v48, %v654_v49  ;;  %v750_v5 = vmul.f32 %v2417_v48, %v626_v12 }
 0x132   : > { %v2480_v8 = vadd.f32 %v757_v61, %v3392_v34  ;;  %v2483_v9 = vadd.f32 %v750_v5, %v2305_v55 }
 0x135   : > { %854 = vperm.xlu1 %1841, %v3393_v60  }
 0x136   : > { %858 = vperm.xlu2 %1839, %v3394_v59   ;;  %886 = vperm.xlu0 %1840, %v2108_v21   ;;  %v630_v18 = vpop.permute.xlu1 %629 }
 0x137   : > { %v751_v26 = vmul.f32 %v2417_v48, %v630_v18  ;;  %v666_v3 = vpop.permute.xlu2 %665  ;;  %v646_v6 = vpop.permute.xlu0 %645 }
 0x138   : > { %v760_v1 = vmul.f32 %v2417_v48, %v666_v3  ;;  %v755_v31 = vmul.f32 %v2417_v48, %v646_v6 }
 0x139   : > { %v2492_v15 = vadd.f32 %v751_v26, %v2301_v10 }
 0x13a   : > { %v2495_v55 = vadd.f32 %v760_v1, %v2303_v11  ;;  %v2498_v57 = vadd.f32 %v755_v31, %v2323_v35 }
 0x13d   : > { %866 = vperm.xlu1 %1841, %v2081_v14  }
 0x13e   : > { %870 = vperm.xlu2 %1839, %v2078_v13   ;;  %898 = vperm.xlu0 %1840, %v2120_v24   ;;  %v638_v21 = vpop.permute.xlu1 %637 }
 0x13f   : > { %v753_v63 = vmul.f32 %v2417_v48, %v638_v21  ;;  %v678_v2 = vpop.permute.xlu2 %677  ;;  %v658_v49 = vpop.permute.xlu0 %657 }
 0x140   : > { %v763_v10 = vmul.f32 %v2417_v48, %v678_v2  ;;  %v758_v12 = vmul.f32 %v2417_v48, %v658_v49  ;;  %v3397_v49 = vld [vmem:[#allocation21_spill] sm:$0xff] }
 0x141   : > { %v2507_v11 = vadd.f32 %v753_v63, %v2319_v4 }
 0x142   : > { %v2510_v35 = vadd.f32 %v763_v10, %v2321_v39  ;;  %v2513_v14 = vadd.f32 %v758_v12, %v2341_v36 }
 0x145   : > { %878 = vperm.xlu1 %1841, %v2093_v17  }
 0x146   : > { %882 = vperm.xlu2 %1839, %v2090_v16   ;;  %910 = vperm.xlu0 %1840, %v2132_v27   ;;  %v650_v13 = vpop.permute.xlu1 %649 }
 0x147   : > { %v756_v24 = vmul.f32 %v2417_v48, %v650_v13  ;;  %v690_v61 = vpop.permute.xlu2 %689  ;;  %v670_v5 = vpop.permute.xlu0 %669  ;;  %v3399_v13 = vld [vmem:[#allocation12_spill] sm:$0xff] }
 0x148   : > { %v766_v4 = vmul.f32 %v2417_v48, %v690_v61  ;;  %v761_v34 = vmul.f32 %v2417_v48, %v670_v5 }
 0x149   : > { %v2522_v39 = vadd.f32 %v756_v24, %v2337_v33  ;;  %v3400_v24 = vld [vmem:[#allocation11_spill] sm:$0xff] }
 0x14a   : > { %v2525_v36 = vadd.f32 %v766_v4, %v2339_v41  ;;  %v2528_v17 = vadd.f32 %v761_v34, %v2359_v0 }
 0x14d   : > { %890 = vperm.xlu1 %1841, %v2105_v20  }
 0x14e   : > { %894 = vperm.xlu2 %1839, %v2102_v19   ;;  %922 = vperm.xlu0 %1840, %v2144_v30   ;;  %v662_v16 = vpop.permute.xlu1 %661 }
 0x14f   : > { %v759_v27 = vmul.f32 %v2417_v48, %v662_v16  ;;  %v702_v60 = vpop.permute.xlu2 %701  ;;  %v682_v59 = vpop.permute.xlu0 %681 }
 0x150   : > { %v769_v33 = vmul.f32 %v2417_v48, %v702_v60  ;;  %v764_v18 = vmul.f32 %v2417_v48, %v682_v59 }
 0x151   : > { %v2537_v41 = vadd.f32 %v759_v27, %v2355_v7 }
 0x152   : > { %v2540_v0 = vadd.f32 %v769_v33, %v2357_v62  ;;  %v2543_v20 = vadd.f32 %v764_v18, %v2377_v38  ;;  %v2590_v33 = vperm.slane %v3384_v43, 3 }
 0x155   : > { %902 = vperm.xlu1 %1841, %v2117_v23  }
 0x156   : > { %906 = vperm.xlu2 %1839, %v2114_v22   ;;  %934 = vperm.xlu0 %1840, %v2153_v32   ;;  %v674_v19 = vpop.permute.xlu1 %673  ;;  %v3395_v22 = vld [vmem:[#allocation10_spill] sm:$0xff]  ;;  %v3396_v32 = vld [vmem:[#allocation9_spill] sm:$0xff] }
 0x157   : > { %v762_v30 = vmul.f32 %v2417_v48, %v674_v19  ;;  %v714_v26 = vpop.permute.xlu2 %713  ;;  %v694_v3 = vpop.permute.xlu0 %693 }
 0x158   : > { %v772_v7 = vmul.f32 %v2417_v48, %v714_v26  ;;  %v767_v6 = vmul.f32 %v2417_v48, %v694_v3 }
 0x159   : > { %v2552_v62 = vadd.f32 %v762_v30, %v2373_v45 }
 0x15a   : > { %v2555_v38 = vadd.f32 %v772_v7, %v2375_v42  ;;  %v2558_v23 = vadd.f32 %v767_v6, %v2395_v40  ;;  %v3398_v42 = vld [vmem:[#allocation22_spill] sm:$0xff] }
 0x15d   : > { %914 = vperm.xlu1 %1841, %v3395_v22  }
 0x15e   : > { %918 = vperm.xlu2 %1839, %v3396_v32   ;;  %v686_v1 = vpop.permute.xlu1 %685 }
 0x15f   : > { %v765_v31 = vmul.f32 %v2417_v48, %v686_v1  ;;  %v726_v21 = vpop.permute.xlu2 %725  ;;  %v706_v63 = vpop.permute.xlu0 %705 }
 0x160   : > { %v775_v2 = vmul.f32 %v2417_v48, %v726_v21  ;;  %v770_v45 = vmul.f32 %v2417_v48, %v706_v63 }
 0x161   : > { %v2566_v10 = vadd.f32 %v765_v31, %v3397_v49 }
 0x162   : > { %v2569_v12 = vadd.f32 %v775_v2, %v3398_v42  ;;  %v2572_v40 = vadd.f32 %v770_v45, %v2413_v56 }
 0x165   : > { %926 = vperm.xlu1 %1841, %v3399_v13  }
 0x166   : > { %930 = vperm.xlu2 %1839, %v3400_v24   ;;  %v698_v61 = vpop.permute.xlu1 %697 }
 0x167   : > { %v768_v5 = vmul.f32 %v2417_v48, %v698_v61  ;;  %v738_v4 = vpop.permute.xlu2 %737  ;;  %v718_v34 = vpop.permute.xlu0 %717 }
 0x168   : > { %v778_v16 = vmul.f32 %v2417_v48, %v738_v4  ;;  %v773_v27 = vmul.f32 %v2417_v48, %v718_v34 }
 0x169   : > { %v2580_v60 = vadd.f32 %v768_v5, %v2409_v29 }
 0x16a   : > { %v2583_v59 = vadd.f32 %v778_v16, %v2411_v37  ;;  %v2586_v56 = vadd.f32 %v773_v27, %v2430_v44  ;;  %v2600_v37 = vld [vmem:[%s3341_s2] ss:$0 sm:$0xff] }
 0x16b   : > { %v2609_v44 = vld [vmem:[%s3342_s3] ss:$0 sm:$0xff] }
 0x16d   : > { %938 = vperm.xlu1 %1841, %v3383_v52  }
 0x16e   : > { %v710_v18 = vpop.permute.xlu1 %709 }
 0x16f   : > { %v771_v19 = vmul.f32 %v2417_v48, %v710_v18  ;;  %v730_v30 = vpop.permute.xlu0 %729 }
 0x170   : > { %v776_v26 = vmul.f32 %v2417_v48, %v730_v30  ;;  %v815_v3 = vpop.permute.xlu2 %814 }
 0x171   : > { %v2595_v29 = vadd.f32 %v771_v19, %v2427_v47  ;;  %v942_v52 = vmul.f32 %v2590_v33, %v815_v3 }
 0x172   : > { %v2604_v43 = vadd.f32 %v776_v26, %v2447_v28 }
 0x173   : > { %v974_v7 = vadd.f32 %v942_v52, %v2433_v25 }
 0x175   : > { %v1010_v47 = vmul.f32 %v2600_v37, %v974_v7 }
 0x176   : > { %v722_v6 = vpop.permute.xlu1 %721 }
 0x177   : > { %v2614_v22 = vadd.f32 %v2609_v44, %v1010_v47  ;;  %v774_v32 = vmul.f32 %v2417_v48, %v722_v6  ;;  %v742_v1 = vpop.permute.xlu0 %741 }
 0x178   : > { %v779_v31 = vmul.f32 %v2417_v48, %v742_v1  ;;  %v827_v28 = vpop.permute.xlu2 %826 }
 0x179   : > { %v1078_v21 = vsub.f32 0.0, %v2614_v22  ;;  %v2620_v63 = vadd.f32 %v774_v32, %v2444_v53  ;;  %v945_v2 = vmul.f32 %v2590_v33, %v827_v28 }
 0x17a   : > { %v2624_v25 = vadd.f32 %v779_v31, %v2464_v51 }
 0x17b   : > { %v1110_v45 = vmul.f32 1.442695, %v1078_v21  ;;  %v977_v49 = vadd.f32 %v945_v2, %v2450_v58 }
 0x17d   : > { %1844 = vpow2.f32 %v1110_v45  ;;  %v1013_v42 = vmul.f32 %v2600_v37, %v977_v49 }
 0x17e   : > { %v734_v13 = vpop.permute.xlu1 %733 }
 0x17f   : > { %v2629_v24 = vadd.f32 %v2609_v44, %v1013_v42  ;;  %v777_v61 = vmul.f32 %v2417_v48, %v734_v13 }
 0x180   : > { %v835_v5 = vpop.permute.xlu2 %834  ;;  %v819_v53 = vpop.permute.xlu0 %818 }
 0x181   : > { %v1081_v4 = vsub.f32 0.0, %v2629_v24  ;;  %v2634_v34 = vadd.f32 %v777_v61, %v2461_v54  ;;  %v947_v51 = vmul.f32 %v2590_v33, %v835_v5  ;;  %v943_v58 = vmul.f32 %v2590_v33, %v819_v53 }
 0x183   : > { %v1845_v16 = vpop.eup %1844  ;;  %v1116_v27 = vmul.f32 1.442695, %v1081_v4  ;;  %v979_v18 = vadd.f32 %v947_v51, %v2467_v46  ;;  %v975_v19 = vadd.f32 %v943_v58, %v2483_v9 }
 0x184   : > { %v1174_v30 = vadd.f32 1.0, %v1845_v16 }
 0x185   : > { %1846 = vpow2.f32 %v1116_v27  ;;  %v1015_v26 = vmul.f32 %v2600_v37, %v979_v18  ;;  %v1011_v3 = vmul.f32 %v2600_v37, %v975_v19 }
 0x186   : > { %1848 = vrcp.f32 %v1174_v30  ;;  %v746_v52 = vpop.permute.xlu1 %745  ;;  %v1215_v58 = vand.u32 2147483647, %v1174_v30  ;;  %vm1211_vm1 = vweird.f32 %v1174_v30 }
 0x187   : > { %v2643_v54 = vadd.f32 %v2609_v44, %v1015_v26  ;;  %v2646_v7 = vadd.f32 %v2609_v44, %v1011_v3  ;;  %v780_v47 = vmul.f32 %v2417_v48, %v746_v52 }
 0x188   : > { %v847_v6 = vpop.permute.xlu2 %846  ;;  %v839_v46 = vpop.permute.xlu0 %838  ;;  %vm1216_vm3 = vcmp.eq.f32.partialorder %v1215_v58, 8.507059e+37 }
 0x189   : > { %v1083_v9 = vsub.f32 0.0, %v2643_v54  ;;  %v1079_v32 = vsub.f32 0.0, %v2646_v7  ;;  %v2652_v1 = vadd.f32 %v780_v47, %v2475_v50  ;;  %v950_v31 = vmul.f32 %v2590_v33, %v847_v6 }
 0x18a   : > { %v948_v28 = vmul.f32 %v2590_v33, %v839_v46  ;;  %v1217_v50 = vand.u32 2147483648, %v1174_v30 }
 0x18b   : > { %v1847_v21 = vpop.eup %1846  ;;  %v1120_v2 = vmul.f32 1.442695, %v1083_v9  ;;  %v1112_v45 = vmul.f32 1.442695, %v1079_v32  ;;  %v982_v49 = vadd.f32 %v950_v31, %v2480_v8 }
 0x18c   : > { %v1849_v42 = vpop.eup %1848  ;;  %v2657_v48 = vadd.f32 1.0, %v1847_v21  ;;  %v980_v13 = vadd.f32 %v948_v28, %v2498_v57  ;;  %v1218_v46 = vor.u32 1.1754944e-38, %v1217_v50 }
 0x18d   : > { %v1207_v61 = vmul.f32 %v1849_v42, %v1174_v30  ;;  %1850 = vpow2.f32 %v1120_v2  ;;  %v1018_v5 = vmul.f32 %v2600_v37, %v982_v49  ;;  %vm1212_vm0 = vweird.f32 %v1849_v42 }
 0x18e   : > { %1852 = vrcp.f32 %v2657_v48  ;;  %v1016_v51 = vmul.f32 %v2600_v37, %v980_v13  ;;  %vm1213_vm2 = vmor %vm1211_vm1, %vm1212_vm0  ;;  %vm1256_vm6 = vweird.f32 %v2657_v48 }
 0x18f   : > { %v1208_v53 = vsub.f32 1.0, %v1207_v61  ;;  %1854 = vpow2.f32 %v1112_v45  ;;  %v2663_v4 = vadd.f32 %v2609_v44, %v1018_v5  ;;  %v823_v8 = vpop.permute.xlu1 %822  ;;  %v1260_v61 = vand.u32 2147483647, %v2657_v48 }
 0x190   : > { %v944_v16 = vmul.f32 %v2590_v33, %v823_v8  ;;  %v859_v57 = vpop.permute.xlu2 %858  ;;  %v851_v27 = vpop.permute.xlu0 %850  ;;  %v2669_v26 = vadd.f32 %v2609_v44, %v1016_v51  ;;  %v1262_v5 = vand.u32 2147483648, %v2657_v48 }
 0x191   : > { %v1209_v18 = vmul.f32 %v1849_v42, %v1208_v53  ;;  %v1086_v19 = vsub.f32 0.0, %v2663_v4  ;;  %v953_v3 = vmul.f32 %v2590_v33, %v859_v57  ;;  %v951_v32 = vmul.f32 %v2590_v33, %v851_v27 }
 0x192   : > { %v976_v52 = vadd.f32 %v944_v16, %v2492_v15  ;;  %v1084_v21 = vsub.f32 0.0, %v2669_v26  ;;  %vm1261_vm7 = vcmp.eq.f32.partialorder %v1260_v61, 8.507059e+37 }
 0x193   : > { %v1851_v47 = vpop.eup %1850  ;;  %v1210_v6 = vadd.f32 %v1849_v42, %v1209_v18  ;;  %v1126_v9 = vmul.f32 1.442695, %v1086_v19  ;;  %v985_v30 = vadd.f32 %v953_v3, %v2495_v55  ;;  %v983_v58 = vadd.f32 %v951_v32, %v2513_v14 }
 0x194   : > { %v1853_v31 = vpop.eup %1852  ;;  %v2675_v28 = vadd.f32 1.0, %v1851_v47  ;;  %v1012_v2 = vmul.f32 %v2600_v37, %v976_v52  ;;  %v1122_v53 = vmul.f32 1.442695, %v1084_v21  ;;  %v1263_v19 = vor.u32 1.1754944e-38, %v1262_v5 }
 0x195   : > { %v1855_v45 = vpop.eup %1854  ;;  %v1214_v15 = vsel %vm1213_vm2, %v1849_v42, %v1210_v6  ;;  %v1252_v49 = vmul.f32 %v1853_v31, %v2657_v48  ;;  %1856 = vpow2.f32 %v1126_v9  ;;  %v1021_v8 = vmul.f32 %v2600_v37, %v985_v30 }
 0x196   : > { %v1219_v13 = vsel %vm1216_vm3, %v1218_v46, %v1214_v15  ;;  %1858 = vrcp.f32 %v2675_v28  ;;  %v2692_v50 = vadd.f32 1.0, %v1855_v45  ;;  %v2695_v51 = vadd.f32 %v2609_v44, %v1012_v2 }
 0x197   : > { %v1686_v55 = vmul.f32 %v1219_v13, %v2614_v22  ;;  %v1253_v42 = vsub.f32 1.0, %v1252_v49  ;;  %vm1257_vm5 = vweird.f32 %v1853_v31  ;;  %v1290_v57 = vand.u32 2147483647, %v2675_v28  ;;  %v831_v14 = vpop.permute.xlu1 %830 }
 0x198   : > { %1860 = vrcp.f32 %v2692_v50  ;;  %v1080_v22 = vsub.f32 0.0, %v2695_v51  ;;  %v2706_v3 = vadd.f32 %v2609_v44, %v1021_v8  ;;  %vm1258_vm8 = vmor %vm1256_vm6, %vm1257_vm5  ;;  %vm1286_vm9 = vweird.f32 %v2675_v28 }
 0x199   : > { %1719 = vst.msk [vmem:[%s2686_s30] sm:$0xff] %vm1718_vm4, %v1686_v55  ;;  %v1254_v16 = vmul.f32 %v1853_v31, %v1253_v42  ;;  %1862 = vpow2.f32 %v1122_v53  ;;  %v1292_v47 = vand.u32 2147483648, %v2675_v28  ;;  %vm2713_vm10 = vcmp.eq.f32.partialorder %v1290_v57, 8.507059e+37 }
 0x19a   : > { %v1114_v48 = vmul.f32 1.442695, %v1080_v22  ;;  %v1089_v21 = vsub.f32 0.0, %v2706_v3  ;;  %v1019_v2 = vmul.f32 %v2600_v37, %v983_v58  ;;  %v1230_v45 = vand.u32 2147483647, %v2692_v50 }
 0x19b   : > { %v1857_v27 = vpop.eup %1856  ;;  %v1255_v18 = vadd.f32 %v1853_v31, %v1254_v16  ;;  %v946_v15 = vmul.f32 %v2590_v33, %v831_v14  ;;  %v1232_v61 = vand.u32 2147483648, %v2692_v50  ;;  %v1293_v42 = vor.u32 1.1754944e-38, %v1292_v47 }
 0x19c   : > { %v1859_v52 = vpop.eup %1858  ;;  %v2710_v6 = vadd.f32 1.0, %v1857_v27  ;;  %vm1226_vm11 = vweird.f32 %v2692_v50  ;;  %v1132_v53 = vmul.f32 1.442695, %v1089_v21  ;;  %v2731_v16 = vadd.f32 %v2609_v44, %v1019_v2 }
 0x19d   : > { %v1259_v46 = vsel %vm1258_vm8, %v1853_v31, %v1255_v18  ;;  %v1282_v9 = vmul.f32 %v1859_v52, %v2675_v28  ;;  %vm1287_vm12 = vweird.f32 %v1859_v52  ;;  %vm2733_vm13 = vcmp.eq.f32.partialorder %v1230_v45, 8.507059e+37 }
 0x19e   : > { %v1264_v30 = vsel %vm1261_vm7, %v1263_v19, %v1259_v46  ;;  %1864 = vrcp.f32 %v2710_v6  ;;  %v1861_v49 = vpop.eup %1860  ;;  %v978_v22 = vadd.f32 %v946_v15, %v2507_v11  ;;  %v1233_v18 = vor.u32 1.1754944e-38, %v1232_v61  ;;  %v871_v19 = vpop.permute.xlu2 %870  ;;  %vm1288_vm15 = vmor %vm1286_vm9, %vm1287_vm12 }
 0x19f   : > { %v1689_v31 = vmul.f32 %v1264_v30, %v2629_v24  ;;  %v1283_v13 = vsub.f32 1.0, %v1282_v9  ;;  %1866 = vpow2.f32 %v1114_v48  ;;  %v1863_v55 = vpop.eup %1862  ;;  %v1222_v5 = vmul.f32 %v1861_v49, %v2692_v50 }
 0x1a0   : > { %v2728_v58 = vadd.f32 1.0, %v1863_v55  ;;  %1868 = vpow2.f32 %v1132_v53  ;;  %vm1331_vm14 = vweird.f32 %v2710_v6  ;;  %vm1227_vm0 = vweird.f32 %v1861_v49 }
 0x1a1   : > { %1722 = vst.msk [vmem:[%s2686_s30 + $0x18] sm:$0xff] %vm1718_vm4, %v1689_v31  ;;  %v1284_v8 = vmul.f32 %v1859_v52, %v1283_v13  ;;  %v1223_v24 = vsub.f32 1.0, %v1222_v5  ;;  %v1335_v48 = vand.u32 2147483647, %v2710_v6  ;;  %v1087_v46 = vsub.f32 0.0, %v2731_v16  ;;  %vm1228_vm1 = vmor %vm1226_vm11, %vm1227_vm0 }
 0x1a2   : > { %1870 = vrcp.f32 %v2728_v58  ;;  %v1337_v2 = vand.u32 2147483648, %v2710_v6  ;;  %v1014_v30 = vmul.f32 %v2600_v37, %v978_v22  ;;  %v956_v31 = vmul.f32 %v2590_v33, %v871_v19 }
 0x1a3   : > { %v1285_v27 = vadd.f32 %v1859_v52, %v1284_v8  ;;  %v1224_v47 = vmul.f32 %v1861_v49, %v1223_v24  ;;  %v1305_v61 = vand.u32 2147483647, %v2728_v58  ;;  %v1307_v55 = vand.u32 2147483648, %v2728_v58 }
 0x1a4   : > { %v1865_v14 = vpop.eup %1864  ;;  %v1128_v32 = vmul.f32 1.442695, %v1087_v46  ;;  %v2765_v24 = vadd.f32 %v2609_v44, %v1014_v30  ;;  %vm2768_vm3 = vcmp.eq.f32.partialorder %v1335_v48, 8.507059e+37  ;;  %vm1301_vm5 = vweird.f32 %v2728_v58  ;;  %v843_v30 = vpop.permute.xlu1 %842 }
 0x1a5   : > { %v1867_v9 = vpop.eup %1866  ;;  %v1289_v21 = vsel %vm1288_vm15, %v1859_v52, %v1285_v27  ;;  %v1327_v11 = vmul.f32 %v1865_v14, %v2710_v6  ;;  %v1225_v28 = vadd.f32 %v1861_v49, %v1224_v47  ;;  %vm1332_vm2 = vweird.f32 %v1865_v14  ;;  %v863_v47 = vpop.permute.xlu0 %862 }
 0x1a6   : > { %v1294_v45 = vsel %vm2713_vm10, %v1293_v42, %v1289_v21  ;;  %v2749_v15 = vadd.f32 1.0, %v1867_v9  ;;  %v1869_v5 = vpop.eup %1868  ;;  %v1338_v27 = vor.u32 1.1754944e-38, %v1337_v2  ;;  %vm1333_vm6 = vmor %vm1331_vm14, %vm1332_vm2  ;;  %vm2781_vm7 = vcmp.eq.f32.partialorder %v1305_v61, 8.507059e+37 }
 0x1a7   : > { %v1691_v13 = vmul.f32 %v1294_v45, %v2643_v54  ;;  %v1328_v52 = vsub.f32 1.0, %v1327_v11  ;;  %v1229_v53 = vsel %vm1228_vm1, %v1861_v49, %v1225_v28  ;;  %v2762_v8 = vadd.f32 1.0, %v1869_v5 }
 0x1a8   : > { %1872 = vrcp.f32 %v2749_v15  ;;  %v1871_v42 = vpop.eup %1870  ;;  %v1234_v54 = vsel %vm2733_vm13, %v1233_v18, %v1229_v53  ;;  %v1245_v57 = vand.u32 2147483647, %v2749_v15  ;;  %v1308_v48 = vor.u32 1.1754944e-38, %v1307_v55  ;;  %v883_v55 = vpop.permute.xlu2 %882 }
 0x1a9   : > { %1724 = vst.msk [vmem:[%s2686_s30 + $0x28] sm:$0xff] %vm1718_vm4, %v1691_v13  ;;  %v1329_v50 = vmul.f32 %v1865_v14, %v1328_v52  ;;  %v1687_v22 = vmul.f32 %v1234_v54, %v2646_v7  ;;  %v1297_v19 = vmul.f32 %v1871_v42, %v2728_v58  ;;  %1874 = vrcp.f32 %v2762_v8 }
 0x1aa   : > { %1876 = vpow2.f32 %v1128_v32  ;;  %vm1241_vm8 = vweird.f32 %v2749_v15  ;;  %v1082_v21 = vsub.f32 0.0, %v2765_v24  ;;  %v988_v11 = vadd.f32 %v956_v31, %v2510_v35 }
 0x1ab   : > { %v1330_v46 = vadd.f32 %v1865_v14, %v1329_v50  ;;  %1720 = vst.msk [vmem:[%s2686_s30 + $0x8] sm:$0xff] %vm1718_vm4, %v1687_v22  ;;  %v1298_v7 = vsub.f32 1.0, %v1297_v19  ;;  %v954_v2 = vmul.f32 %v2590_v33, %v863_v47  ;;  %vm1302_vm9 = vweird.f32 %v1871_v42 }
 0x1ac   : > { %v1247_v13 = vand.u32 2147483648, %v2749_v15  ;;  %vm2794_vm10 = vcmp.eq.f32.partialorder %v1245_v57, 8.507059e+37  ;;  %v1380_v35 = vand.u32 2147483647, %v2762_v8  ;;  %v1118_v31 = vmul.f32 1.442695, %v1082_v21  ;;  %vm1303_vm11 = vmor %vm1301_vm5, %vm1302_vm9 }
 0x1ad   : > { %v1334_v9 = vsel %vm1333_vm6, %v1865_v14, %v1330_v46  ;;  %v1299_v28 = vmul.f32 %v1871_v42, %v1298_v7  ;;  %v1024_v53 = vmul.f32 %v2600_v37, %v988_v11  ;;  %v986_v32 = vadd.f32 %v954_v2, %v2528_v17 }
 0x1ae   : > { %v1873_v45 = vpop.eup %1872  ;;  %v1339_v6 = vsel %vm2768_vm3, %v1338_v27, %v1334_v9  ;;  %v949_v54 = vmul.f32 %v2590_v33, %v843_v30  ;;  %v1382_v22 = vand.u32 2147483648, %v2762_v8  ;;  %1878 = vpow2.f32 %v1118_v31 }
 0x1af   : > { %v1694_v14 = vmul.f32 %v1339_v6, %v2663_v4  ;;  %v1237_v52 = vmul.f32 %v1873_v45, %v2749_v15  ;;  %v1300_v5 = vadd.f32 %v1871_v42, %v1299_v28  ;;  %v1875_v50 = vpop.eup %1874  ;;  %vm1242_vm12 = vweird.f32 %v1873_v45 }
 0x1b0   : > { %v1877_v49 = vpop.eup %1876  ;;  %v1372_v19 = vmul.f32 %v1875_v50, %v2762_v8  ;;  %v2809_v17 = vadd.f32 %v2609_v44, %v1024_v53  ;;  %v959_v47 = vmul.f32 %v2590_v33, %v883_v55  ;;  %v1022_v7 = vmul.f32 %v2600_v37, %v986_v32  ;;  %vm1243_vm14 = vmor %vm1241_vm8, %vm1242_vm12 }
 0x1b1   : > { %1727 = vst.msk [vmem:[%s2686_s30 + $0x40] sm:$0xff] %vm1718_vm4, %v1694_v14  ;;  %v1238_v4 = vsub.f32 1.0, %v1237_v52  ;;  %v1304_v27 = vsel %vm1303_vm11, %v1871_v42, %v1300_v5  ;;  %v2814_v57 = vadd.f32 1.0, %v1877_v49  ;;  %v981_v11 = vadd.f32 %v949_v54, %v2522_v39  ;;  %v875_v52 = vpop.permute.xlu0 %874 }
 0x1b2   : > { %v1309_v46 = vsel %vm2781_vm7, %v1308_v48, %v1304_v27  ;;  %v1373_v21 = vsub.f32 1.0, %v1372_v19  ;;  %v1092_v42 = vsub.f32 0.0, %v2809_v17  ;;  %v1248_v30 = vor.u32 1.1754944e-38, %v1247_v13  ;;  %v895_v27 = vpop.permute.xlu2 %894 }
 0x1b3   : > { %v1239_v58 = vmul.f32 %v1873_v45, %v1238_v4  ;;  %v1692_v9 = vmul.f32 %v1309_v46, %v2669_v26  ;;  %vm1376_vm13 = vweird.f32 %v2762_v8  ;;  %1880 = vrcp.f32 %v2814_v57 }
 0x1b4   : > { %v1374_v18 = vmul.f32 %v1875_v50, %v1373_v21  ;;  %vm1377_vm15 = vweird.f32 %v1875_v50  ;;  %v1138_v26 = vmul.f32 1.442695, %v1092_v42  ;;  %v2828_v48 = vadd.f32 %v2609_v44, %v1022_v7  ;;  %v1879_v6 = vpop.eup %1878 }
 0x1b5   : > { %v1240_v2 = vadd.f32 %v1873_v45, %v1239_v58  ;;  %1725 = vst.msk [vmem:[%s2686_s30 + $0x30] sm:$0xff] %vm1718_vm4, %v1692_v9  ;;  %vm2830_vm0 = vcmp.eq.f32.partialorder %v1380_v35, 8.507059e+37  ;;  %v1383_v13 = vor.u32 1.1754944e-38, %v1382_v22  ;;  %v1017_v14 = vmul.f32 %v2600_v37, %v981_v11  ;;  %vm1378_vm1 = vmor %vm1376_vm13, %vm1377_vm15  ;;  %v855_v22 = vpop.permute.xlu1 %854 }
 0x1b6   : > { %v1375_v31 = vadd.f32 %v1875_v50, %v1374_v18  ;;  %v2837_v55 = vadd.f32 1.0, %v1879_v6  ;;  %v991_v5 = vadd.f32 %v959_v47, %v2525_v36  ;;  %1882 = vpow2.f32 %v1138_v26 }
 0x1b7   : > { %v1244_v39 = vsel %vm1243_vm14, %v1873_v45, %v1240_v2  ;;  %v1090_v45 = vsub.f32 0.0, %v2828_v48  ;;  %v2845_v35 = vadd.f32 %v2609_v44, %v1017_v14  ;;  %v1350_v61 = vand.u32 2147483647, %v2814_v57 }
 0x1b8   : > { %v1249_v15 = vsel %vm2794_vm10, %v1248_v30, %v1244_v39  ;;  %v1379_v32 = vsel %vm1378_vm1, %v1875_v50, %v1375_v31  ;;  %1884 = vrcp.f32 %v2837_v55  ;;  %v957_v54 = vmul.f32 %v2590_v33, %v875_v52 }
 0x1b9   : > { %v1688_v53 = vmul.f32 %v1249_v15, %v2695_v51  ;;  %v1881_v36 = vpop.eup %1880  ;;  %v1384_v51 = vsel %vm2830_vm0, %v1383_v13, %v1379_v32  ;;  %v1134_v8 = vmul.f32 1.442695, %v1090_v45  ;;  %v1085_v4 = vsub.f32 0.0, %v2845_v35 }
 0x1ba   : > { %v1697_v49 = vmul.f32 %v1384_v51, %v2706_v3  ;;  %v1342_v50 = vmul.f32 %v1881_v36, %v2814_v57  ;;  %vm1346_vm2 = vweird.f32 %v2814_v57  ;;  %v1352_v19 = vand.u32 2147483648, %v2814_v57 }
 0x1bb   : > { %1721 = vst.msk [vmem:[%s2686_s30 + $0x10] sm:$0xff] %vm1718_vm4, %v1688_v53  ;;  %1886 = vpow2.f32 %v1134_v8  ;;  %v1124_v47 = vmul.f32 1.442695, %v1085_v4  ;;  %v1027_v46 = vmul.f32 %v2600_v37, %v991_v5  ;;  %vm2862_vm3 = vcmp.eq.f32.partialorder %v1350_v61, 8.507059e+37  ;;  %v887_v4 = vpop.permute.xlu0 %886 }
 0x1bc   : > { %1730 = vst.msk [vmem:[%s2686_s30 + $0x58] sm:$0xff] %vm1718_vm4, %v1697_v49  ;;  %v1343_v58 = vsub.f32 1.0, %v1342_v50  ;;  %v989_v3 = vadd.f32 %v957_v54, %v2543_v20  ;;  %v952_v9 = vmul.f32 %v2590_v33, %v855_v22  ;;  %v1883_v21 = vpop.eup %1882  ;;  %vm1347_vm5 = vweird.f32 %v1881_v36 }
 0x1bd   : > { %1888 = vpow2.f32 %v1124_v47  ;;  %v2869_v42 = vadd.f32 %v2609_v44, %v1027_v46  ;;  %v962_v11 = vmul.f32 %v2590_v33, %v895_v27  ;;  %v2872_v18 = vadd.f32 1.0, %v1883_v21  ;;  %vm1348_vm7 = vmor %vm1346_vm2, %vm1347_vm5  ;;  %v867_v22 = vpop.permute.xlu1 %866 }
 0x1be   : > { %v1885_v2 = vpop.eup %1884  ;;  %v1344_v30 = vmul.f32 %v1881_v36, %v1343_v58  ;;  %v1025_v26 = vmul.f32 %v2600_v37, %v989_v3  ;;  %v984_v6 = vadd.f32 %v952_v9, %v2537_v41  ;;  %v1353_v39 = vor.u32 1.1754944e-38, %v1352_v19 }
 0x1bf   : > { %v1267_v20 = vmul.f32 %v1885_v2, %v2837_v55  ;;  %vm1271_vm6 = vweird.f32 %v2837_v55  ;;  %v1095_v28 = vsub.f32 0.0, %v2869_v42  ;;  %v1275_v14 = vand.u32 2147483647, %v2837_v55 }
 0x1c0   : > { %v1345_v13 = vadd.f32 %v1881_v36, %v1344_v30  ;;  %v1277_v52 = vand.u32 2147483648, %v2837_v55  ;;  %1890 = vrcp.f32 %v2872_v18  ;;  %vm1272_vm8 = vweird.f32 %v1885_v2 }
 0x1c1   : > { %v1887_v15 = vpop.eup %1886  ;;  %v1268_v41 = vsub.f32 1.0, %v1267_v20  ;;  %v1144_v31 = vmul.f32 1.442695, %v1095_v28  ;;  %v2886_v5 = vadd.f32 %v2609_v44, %v1025_v26  ;;  %v1020_v32 = vmul.f32 %v2600_v37, %v984_v6  ;;  %vm1273_vm10 = vmor %vm1271_vm6, %vm1272_vm8 }
 0x1c2   : > { %v1349_v53 = vsel %vm1348_vm7, %v1881_v36, %v1345_v13  ;;  %v2888_v45 = vadd.f32 1.0, %v1887_v15  ;;  %v994_v61 = vadd.f32 %v962_v11, %v2540_v0  ;;  %v1425_v8 = vand.u32 2147483647, %v2872_v18 }
 0x1c3   : > { %v1889_v54 = vpop.eup %1888  ;;  %v1354_v51 = vsel %vm2862_vm3, %v1353_v39, %v1349_v53  ;;  %v1269_v57 = vmul.f32 %v1885_v2, %v1268_v41  ;;  %1892 = vpow2.f32 %v1144_v31  ;;  %vm2896_vm9 = vcmp.eq.f32.partialorder %v1275_v14, 8.507059e+37 }
 0x1c4   : > { %v1695_v49 = vmul.f32 %v1354_v51, %v2731_v16  ;;  %v1278_v50 = vor.u32 1.1754944e-38, %v1277_v52  ;;  %1894 = vrcp.f32 %v2888_v45  ;;  %v1427_v27 = vand.u32 2147483648, %v2872_v18 }
 0x1c5   : > { %v1270_v0 = vadd.f32 %v1885_v2, %v1269_v57  ;;  %v2902_v19 = vadd.f32 1.0, %v1889_v54  ;;  %v1093_v47 = vsub.f32 0.0, %v2886_v5  ;;  %v2911_v16 = vadd.f32 %v2609_v44, %v1020_v32 }
 0x1c6   : > { %v1891_v46 = vpop.eup %1890  ;;  %1728 = vst.msk [vmem:[%s2686_s30 + $0x48] sm:$0xff] %vm1718_vm4, %v1695_v49  ;;  %v1030_v58 = vmul.f32 %v2600_v37, %v994_v61  ;;  %v960_v7 = vmul.f32 %v2590_v33, %v887_v4  ;;  %v955_v3 = vmul.f32 %v2590_v33, %v867_v22  ;;  %vm1421_vm11 = vweird.f32 %v2872_v18 }
 0x1c7   : > { %v1274_v9 = vsel %vm1273_vm10, %v1885_v2, %v1270_v0  ;;  %v1417_v21 = vmul.f32 %v1891_v46, %v2872_v18  ;;  %vm2918_vm12 = vcmp.eq.f32.partialorder %v1425_v8, 8.507059e+37  ;;  %v1395_v30 = vand.u32 2147483647, %v2888_v45 }
 0x1c8   : > { %v1279_v55 = vsel %vm2896_vm9, %v1278_v50, %v1274_v9  ;;  %v1397_v26 = vand.u32 2147483648, %v2888_v45  ;;  %1896 = vrcp.f32 %v2902_v19  ;;  %v1428_v20 = vor.u32 1.1754944e-38, %v1427_v27  ;;  %v907_v27 = vpop.permute.xlu2 %906 }
 0x1c9   : > { %v1893_v6 = vpop.eup %1892  ;;  %v1690_v2 = vmul.f32 %v1279_v55, %v2765_v24  ;;  %v1418_v39 = vsub.f32 1.0, %v1417_v21  ;;  %v1140_v28 = vmul.f32 1.442695, %v1093_v47  ;;  %v1088_v52 = vsub.f32 0.0, %v2911_v16 }
 0x1ca   : > { %v1895_v13 = vpop.eup %1894  ;;  %v2928_v14 = vadd.f32 1.0, %v1893_v6  ;;  %v2932_v15 = vadd.f32 %v2609_v44, %v1030_v58  ;;  %v992_v41 = vadd.f32 %v960_v7, %v2558_v23  ;;  %vm1422_vm13 = vweird.f32 %v1891_v46 }
 0x1cb   : > { %1723 = vst.msk [vmem:[%s2686_s30 + $0x20] sm:$0xff] %vm1718_vm4, %v1690_v2  ;;  %v1419_v31 = vmul.f32 %v1891_v46, %v1418_v39  ;;  %v1387_v53 = vmul.f32 %v1895_v13, %v2888_v45  ;;  %v1320_v24 = vand.u32 2147483647, %v2902_v19  ;;  %vm1391_vm14 = vweird.f32 %v2888_v45  ;;  %vm1423_vm0 = vmor %vm1421_vm11, %vm1422_vm13 }
 0x1cc   : > { %vm2940_vm15 = vcmp.eq.f32.partialorder %v1395_v30, 8.507059e+37  ;;  %v1398_v61 = vor.u32 1.1754944e-38, %v1397_v26  ;;  %1898 = vrcp.f32 %v2928_v14  ;;  %v1130_v23 = vmul.f32 1.442695, %v1088_v52 }
 0x1cd   : > { %v1420_v54 = vadd.f32 %v1891_v46, %v1419_v31  ;;  %v1388_v51 = vsub.f32 1.0, %v1387_v53  ;;  %1900 = vpow2.f32 %v1140_v28  ;;  %vm1316_vm1 = vweird.f32 %v2902_v19 }
 0x1ce   : > { %v1897_v57 = vpop.eup %1896  ;;  %v1322_v8 = vand.u32 2147483648, %v2902_v19  ;;  %v1098_v4 = vsub.f32 0.0, %v2932_v15  ;;  %v1028_v22 = vmul.f32 %v2600_v37, %v992_v41  ;;  %vm1392_vm2 = vweird.f32 %v1895_v13 }
 0x1cf   : > { %v1424_v49 = vsel %vm1423_vm0, %v1891_v46, %v1420_v54  ;;  %v1389_v36 = vmul.f32 %v1895_v13, %v1388_v51  ;;  %v1312_v50 = vmul.f32 %v1897_v57, %v2902_v19  ;;  %vm2952_vm3 = vcmp.eq.f32.partialorder %v1320_v24, 8.507059e+37  ;;  %vm1393_vm5 = vmor %vm1391_vm14, %vm1392_vm2 }
 0x1d0   : > { %v1429_v18 = vsel %vm2918_vm12, %v1428_v20, %v1424_v49  ;;  %1902 = vpow2.f32 %v1130_v23  ;;  %v1150_v47 = vmul.f32 1.442695, %v1098_v4  ;;  %v2959_v58 = vadd.f32 %v2609_v44, %v1028_v22 }
 0x1d1   : > { %v1700_v46 = vmul.f32 %v1429_v18, %v2809_v17  ;;  %v1390_v7 = vadd.f32 %v1895_v13, %v1389_v36  ;;  %v1313_v9 = vsub.f32 1.0, %v1312_v50  ;;  %v987_v21 = vadd.f32 %v955_v3, %v2552_v62  ;;  %v879_v50 = vpop.permute.xlu1 %878 }
 0x1d2   : > { %v1899_v55 = vpop.eup %1898  ;;  %v1323_v30 = vor.u32 1.1754944e-38, %v1322_v8  ;;  %1904 = vpow2.f32 %v1150_v47  ;;  %v1096_v11 = vsub.f32 0.0, %v2959_v58  ;;  %v965_v26 = vmul.f32 %v2590_v33, %v907_v27 }
 0x1d3   : > { %v1901_v6 = vpop.eup %1900  ;;  %1733 = vst.msk [vmem:[%s2686_s30 + $0x70] sm:$0xff] %vm1718_vm4, %v1700_v46  ;;  %v1394_v2 = vsel %vm1393_vm5, %v1895_v13, %v1390_v7  ;;  %v1314_v39 = vmul.f32 %v1897_v57, %v1313_v9  ;;  %vm1317_vm6 = vweird.f32 %v1897_v57  ;;  %v1462_v17 = vmul.f32 %v1899_v55, %v2928_v14  ;;  %v899_v13 = vpop.permute.xlu0 %898 }
 0x1d4   : > { %v1399_v62 = vsel %vm2940_vm15, %v1398_v61, %v1394_v2  ;;  %v2972_v45 = vadd.f32 1.0, %v1901_v6  ;;  %v1146_v3 = vmul.f32 1.442695, %v1096_v11  ;;  %v1023_v20 = vmul.f32 %v2600_v37, %v987_v21  ;;  %vm1318_vm7 = vmor %vm1316_vm1, %vm1317_vm6  ;;  %v3075_v11 = vld [vmem:[%s3341_s2] ss:$0 sm:$0xff] }
 0x1d5   : > { %v1698_v28 = vmul.f32 %v1399_v62, %v2828_v48  ;;  %v1315_v52 = vadd.f32 %v1897_v57, %v1314_v39  ;;  %v1463_v41 = vsub.f32 1.0, %v1462_v17  ;;  %v1472_v31 = vand.u32 2147483648, %v2928_v14 }
 0x1d6   : > { %v1903_v53 = vpop.eup %1902  ;;  %vm1467_vm8 = vweird.f32 %v1899_v55  ;;  %v1470_v24 = vand.u32 2147483647, %v2928_v14  ;;  %1906 = vrcp.f32 %v2972_v45  ;;  %v997_v32 = vadd.f32 %v965_v26, %v2555_v38 }
 0x1d7   : > { %1731 = vst.msk [vmem:[%s2686_s30 + $0x60] sm:$0xff] %vm1718_vm4, %v1698_v28  ;;  %v1319_v61 = vsel %vm1318_vm7, %v1897_v57, %v1315_v52  ;;  %v1464_v48 = vmul.f32 %v1899_v55, %v1463_v41  ;;  %v2984_v54 = vadd.f32 1.0, %v1903_v53  ;;  %1908 = vpow2.f32 %v1146_v3 }
 0x1d8   : > { %v1905_v51 = vpop.eup %1904  ;;  %v1324_v19 = vsel %vm2952_vm3, %v1323_v30, %v1319_v61  ;;  %vm1466_vm9 = vweird.f32 %v2928_v14  ;;  %v2990_v23 = vadd.f32 %v2609_v44, %v1023_v20  ;;  %v963_v8 = vmul.f32 %v2590_v33, %v899_v13 }
 0x1d9   : > { %v1693_v38 = vmul.f32 %v1324_v19, %v2845_v35  ;;  %v1465_v4 = vadd.f32 %v1899_v55, %v1464_v48  ;;  %v1473_v57 = vor.u32 1.1754944e-38, %v1472_v31  ;;  %1910 = vrcp.f32 %v2984_v54  ;;  %vm1468_vm10 = vmor %vm1466_vm9, %vm1467_vm8 }
 0x1da   : > { %v1440_v22 = vand.u32 2147483647, %v2972_v45  ;;  %v1442_v49 = vand.u32 2147483648, %v2972_v45  ;;  %v2998_v36 = vadd.f32 1.0, %v1905_v51  ;;  %v1091_v14 = vsub.f32 0.0, %v2990_v23 }
 0x1db   : > { %1726 = vst.msk [vmem:[%s2686_s30 + $0x38] sm:$0xff] %vm1718_vm4, %v1693_v38  ;;  %v1469_v0 = vsel %vm1468_vm10, %v1899_v55, %v1465_v4  ;;  %vm1471_vm11 = vcmp.eq.f32.partialorder %v1470_v24, 8.507059e+37  ;;  %v1365_v35 = vand.u32 2147483647, %v2984_v54  ;;  %v1033_v27 = vmul.f32 %v2600_v37, %v997_v32  ;;  %v919_v32 = vpop.permute.xlu2 %918 }
 0x1dc   : > { %v1907_v18 = vpop.eup %1906  ;;  %v1474_v47 = vsel %vm1471_vm11, %v1473_v57, %v1469_v0  ;;  %v1367_v46 = vand.u32 2147483648, %v2984_v54  ;;  %1912 = vrcp.f32 %v2998_v36  ;;  %v995_v7 = vadd.f32 %v963_v8, %v2572_v40 }
 0x1dd   : > { %v1909_v9 = vpop.eup %1908  ;;  %v1703_v21 = vmul.f32 %v1474_v47, %v2869_v42  ;;  %v1432_v30 = vmul.f32 %v1907_v18, %v2972_v45  ;;  %vm1436_vm12 = vweird.f32 %v2972_v45  ;;  %v958_v55 = vmul.f32 %v2590_v33, %v879_v50 }
 0x1de   : > { %vm3012_vm13 = vcmp.eq.f32.partialorder %v1440_v22, 8.507059e+37  ;;  %v1443_v26 = vor.u32 1.1754944e-38, %v1442_v49  ;;  %v3016_v6 = vadd.f32 1.0, %v1909_v9  ;;  %v1136_v2 = vmul.f32 1.442695, %v1091_v14 }
 0x1df   : > { %v1911_v39 = vpop.eup %1910  ;;  %1736 = vst.msk [vmem:[%s2686_s30 + $0x88] sm:$0xff] %vm1718_vm4, %v1703_v21  ;;  %v1433_v40 = vsub.f32 1.0, %v1432_v30  ;;  %vm1361_vm14 = vweird.f32 %v2984_v54  ;;  %v1515_v42 = vand.u32 2147483647, %v2998_v36  ;;  %v3023_v17 = vadd.f32 %v2609_v44, %v1033_v27  ;;  %v891_v30 = vpop.permute.xlu1 %890 }
 0x1e0   : > { %vm1437_vm15 = vweird.f32 %v1907_v18  ;;  %v1357_v62 = vmul.f32 %v1911_v39, %v2984_v54  ;;  %vm3026_vm0 = vcmp.eq.f32.partialorder %v1365_v35, 8.507059e+37  ;;  %v1368_v20 = vor.u32 1.1754944e-38, %v1367_v46 }
 0x1e1   : > { %v1031_v28 = vmul.f32 %v2600_v37, %v995_v7  ;;  %v1434_v52 = vmul.f32 %v1907_v18, %v1433_v40  ;;  %vm1511_vm1 = vweird.f32 %v2998_v36  ;;  %1914 = vrcp.f32 %v3016_v6  ;;  %vm1438_vm5 = vmor %vm1436_vm12, %vm1437_vm15 }
 0x1e2   : > { %v990_v41 = vadd.f32 %v958_v55, %v2566_v10  ;;  %v1913_v31 = vpop.eup %1912  ;;  %v1358_v13 = vsub.f32 1.0, %v1357_v62  ;;  %v1517_v53 = vand.u32 2147483648, %v2998_v36  ;;  %1916 = vpow2.f32 %v1136_v2 }
 0x1e3   : > { %v1101_v24 = vsub.f32 0.0, %v3023_v17  ;;  %v1435_v61 = vadd.f32 %v1907_v18, %v1434_v52  ;;  %vm1362_vm2 = vweird.f32 %v1911_v39  ;;  %v1507_v48 = vmul.f32 %v1913_v31, %v2998_v36  ;;  %v3092_v52 = vld [vmem:[%s3342_s3] ss:$0 sm:$0xff] }
 0x1e4   : > { %vm3037_vm3 = vcmp.eq.f32.partialorder %v1515_v42, 8.507059e+37  ;;  %v1359_v10 = vmul.f32 %v1911_v39, %v1358_v13  ;;  %vm1512_vm6 = vweird.f32 %v1913_v31  ;;  %v3045_v8 = vadd.f32 %v2609_v44, %v1031_v28  ;;  %vm1363_vm7 = vmor %vm1361_vm14, %vm1362_vm2 }
 0x1e5   : > { %v1156_v19 = vmul.f32 1.442695, %v1101_v24  ;;  %v1439_v38 = vsel %vm1438_vm5, %v1907_v18, %v1435_v61  ;;  %v1508_v4 = vsub.f32 1.0, %v1507_v48  ;;  %v1026_v57 = vmul.f32 %v2600_v37, %v990_v41  ;;  %vm1513_vm8 = vmor %vm1511_vm1, %vm1512_vm6 }
 0x1e6   : > { %v968_v22 = vmul.f32 %v2590_v33, %v919_v32  ;;  %v1444_v49 = vsel %vm3012_vm13, %v1443_v26, %v1439_v38  ;;  %v1360_v14 = vadd.f32 %v1911_v39, %v1359_v10  ;;  %v1099_v45 = vsub.f32 0.0, %v3045_v8 }
 0x1e7   : > { %1918 = vpow2.f32 %v1156_v19  ;;  %v1915_v50 = vpop.eup %1914  ;;  %v1701_v0 = vmul.f32 %v1444_v49, %v2886_v5  ;;  %v1509_v35 = vmul.f32 %v1913_v31, %v1508_v4  ;;  %v3057_v37 = vadd.f32 %v2609_v44, %v1026_v57 }
 0x1e8   : > { %v1000_v27 = vadd.f32 %v968_v22, %v2569_v12  ;;  %v1917_v18 = vpop.eup %1916  ;;  %v1364_v47 = vsel %vm1363_vm7, %v1911_v39, %v1360_v14  ;;  %v1518_v46 = vor.u32 1.1754944e-38, %v1517_v53  ;;  %v1477_v7 = vmul.f32 %v1915_v50, %v3016_v6  ;;  %v931_v14 = vpop.permute.xlu2 %930 }
 0x1e9   : > { %v1152_v9 = vmul.f32 1.442695, %v1099_v45  ;;  %1734 = vst.msk [vmem:[%s2686_s30 + $0x78] sm:$0xff] %vm1718_vm4, %v1701_v0  ;;  %v1369_v5 = vsel %vm3026_vm0, %v1368_v20, %v1364_v47  ;;  %v1510_v21 = vadd.f32 %v1913_v31, %v1509_v35  ;;  %v3065_v54 = vadd.f32 1.0, %v1917_v18  ;;  %v3118_v0 = vpop.permute.xlu1 %902 }
 0x1ea   : > { %v1094_v44 = vsub.f32 0.0, %v3057_v37  ;;  %v1696_v12 = vmul.f32 %v1369_v5, %v2911_v16  ;;  %v1478_v55 = vsub.f32 1.0, %v1477_v7  ;;  %v1036_v26 = vmul.f32 %v3075_v11, %v1000_v27  ;;  %v911_v16 = vpop.permute.xlu0 %910 }
 0x1eb   : > { %1920 = vpow2.f32 %v1152_v9  ;;  %v1514_v2 = vsel %vm1513_vm8, %v1913_v31, %v1510_v21  ;;  %v1485_v39 = vand.u32 2147483647, %v3016_v6  ;;  %v1487_v40 = vand.u32 2147483648, %v3016_v6 }
 0x1ec   : > { %1922 = vrcp.f32 %v3065_v54  ;;  %1729 = vst.msk [vmem:[%s2686_s30 + $0x50] sm:$0xff] %vm1718_vm4, %v1696_v12  ;;  %v1519_v42 = vsel %vm3037_vm3, %v1518_v46, %v1514_v2  ;;  %v1479_v62 = vmul.f32 %v1915_v50, %v1478_v55  ;;  %vm1482_vm9 = vweird.f32 %v1915_v50 }
 0x1ed   : > { %v1919_v36 = vpop.eup %1918  ;;  %v1142_v3 = vmul.f32 1.442695, %v1094_v44  ;;  %v1706_v20 = vmul.f32 %v1519_v42, %v2932_v15  ;;  %vm1481_vm10 = vweird.f32 %v3016_v6  ;;  %v3095_v41 = vadd.f32 %v3092_v52, %v1036_v26 }
 0x1ee   : > { %v3087_v28 = vadd.f32 1.0, %v1919_v36  ;;  %v1480_v31 = vadd.f32 %v1915_v50, %v1479_v62  ;;  %v1410_v13 = vand.u32 2147483647, %v3065_v54  ;;  %v966_v53 = vmul.f32 %v2590_v33, %v911_v16  ;;  %vm1483_vm11 = vmor %vm1481_vm10, %vm1482_vm9 }
 0x1ef   : > { %1924 = vpow2.f32 %v1142_v3  ;;  %1739 = vst.msk [vmem:[%s2686_s30 + $0xa0] sm:$0xff] %vm1718_vm4, %v1706_v20  ;;  %vm1486_vm12 = vcmp.eq.f32.partialorder %v1485_v39, 8.507059e+37  ;;  %v1488_v15 = vor.u32 1.1754944e-38, %v1487_v40  ;;  %v1412_v6 = vand.u32 2147483648, %v3065_v54 }
 0x1f0   : > { %1926 = vrcp.f32 %v3087_v28  ;;  %v1484_v32 = vsel %vm1483_vm11, %v1915_v50, %v1480_v31  ;;  %v1104_v61 = vsub.f32 0.0, %v3095_v41  ;;  %v998_v48 = vadd.f32 %v966_v53, %v2586_v56 }
 0x1f1   : > { %v1921_v24 = vpop.eup %1920  ;;  %v961_v51 = vmul.f32 %v2590_v33, %v891_v30  ;;  %v1489_v19 = vsel %vm1486_vm12, %v1488_v15, %v1484_v32  ;;  %vm1406_vm13 = vweird.f32 %v3065_v54  ;;  %vm3111_vm14 = vcmp.eq.f32.partialorder %v1410_v13, 8.507059e+37 }
 0x1f2   : > { %v1923_v10 = vpop.eup %1922  ;;  %v3107_v38 = vadd.f32 1.0, %v1921_v24  ;;  %v1704_v4 = vmul.f32 %v1489_v19, %v2959_v58  ;;  %v1162_v49 = vmul.f32 1.442695, %v1104_v61  ;;  %v1413_v56 = vor.u32 1.1754944e-38, %v1412_v6  ;;  %v923_v9 = vpop.permute.xlu0 %922 }
 0x1f3   : > { %v1402_v57 = vmul.f32 %v1923_v10, %v3065_v54  ;;  %v1560_v45 = vand.u32 2147483647, %v3087_v28  ;;  %v1562_v50 = vand.u32 2147483648, %v3087_v28  ;;  %v1034_v27 = vmul.f32 %v3075_v11, %v998_v48 }
 0x1f4   : > { %1928 = vrcp.f32 %v3107_v38  ;;  %1737 = vst.msk [vmem:[%s2686_s30 + $0x90] sm:$0xff] %vm1718_vm4, %v1704_v4  ;;  %v993_v18 = vadd.f32 %v961_v51, %v2580_v60  ;;  %vm1407_vm15 = vweird.f32 %v1923_v10  ;;  %vm1556_vm0 = vweird.f32 %v3087_v28 }
 0x1f5   : > { %v1925_v35 = vpop.eup %1924  ;;  %v1403_v58 = vsub.f32 1.0, %v1402_v57  ;;  %1930 = vpow2.f32 %v1162_v49  ;;  %v971_v7 = vmul.f32 %v2590_v33, %v931_v14  ;;  %v1530_v44 = vand.u32 2147483647, %v3107_v38  ;;  %vm1408_vm2 = vmor %vm1406_vm13, %vm1407_vm15 }
 0x1f6   : > { %v1927_v47 = vpop.eup %1926  ;;  %v3125_v46 = vadd.f32 1.0, %v1925_v35  ;;  %v3131_v30 = vadd.f32 %v3092_v52, %v1034_v27  ;;  %vm3133_vm1 = vcmp.eq.f32.partialorder %v1560_v45, 8.507059e+37  ;;  %v1563_v60 = vor.u32 1.1754944e-38, %v1562_v50 }
 0x1f7   : > { %v1404_v5 = vmul.f32 %v1923_v10, %v1403_v58  ;;  %v1552_v21 = vmul.f32 %v1927_v47, %v3087_v28  ;;  %v1532_v55 = vand.u32 2147483648, %v3107_v38  ;;  %v1029_v40 = vmul.f32 %v3075_v11, %v993_v18 }
 0x1f8   : > { %1932 = vrcp.f32 %v3125_v46  ;;  %v1102_v39 = vsub.f32 0.0, %v3131_v30  ;;  %vm1557_vm3 = vweird.f32 %v1927_v47  ;;  %vm1526_vm5 = vweird.f32 %v3107_v38 }
 0x1f9   : > { %v1405_v26 = vadd.f32 %v1923_v10, %v1404_v5  ;;  %v1553_v2 = vsub.f32 1.0, %v1552_v21  ;;  %v1457_v36 = vand.u32 2147483648, %v3125_v46  ;;  %v1003_v42 = vadd.f32 %v971_v7, %v2583_v59  ;;  %vm1558_vm8 = vmor %vm1556_vm0, %vm1557_vm3 }
 0x1fa   : > { %v1929_v16 = vpop.eup %1928  ;;  %vm3148_vm6 = vcmp.eq.f32.partialorder %v1530_v44, 8.507059e+37  ;;  %v1455_v53 = vand.u32 2147483647, %v3125_v46  ;;  %v1533_v15 = vor.u32 1.1754944e-38, %v1532_v55  ;;  %v1158_v24 = vmul.f32 1.442695, %v1102_v39  ;;  %v935_v50 = vpop.permute.xlu0 %934 }
 0x1fb   : > { %v1931_v62 = vpop.eup %1930  ;;  %v1409_v3 = vsel %vm1408_vm2, %v1923_v10, %v1405_v26  ;;  %v1554_v20 = vmul.f32 %v1927_v47, %v1553_v2  ;;  %v1522_v31 = vmul.f32 %v1929_v16, %v3107_v38  ;;  %vm1451_vm7 = vweird.f32 %v3125_v46 }
 0x1fc   : > { %v1414_v54 = vsel %vm3111_vm14, %v1413_v56, %v1409_v3  ;;  %v3155_v6 = vadd.f32 1.0, %v1931_v62  ;;  %v3160_v48 = vadd.f32 %v3092_v52, %v1029_v40  ;;  %v1458_v10 = vor.u32 1.1754944e-38, %v1457_v36 }
 0x1fd   : > { %v1699_v59 = vmul.f32 %v1414_v54, %v2990_v23  ;;  %v1555_v32 = vadd.f32 %v1927_v47, %v1554_v20  ;;  %v1523_v61 = vsub.f32 1.0, %v1522_v31  ;;  %v1039_v19 = vmul.f32 %v3075_v11, %v1003_v42  ;;  %v915_v23 = vpop.permute.xlu1 %914 }
 0x1fe   : > { %v1933_v51 = vpop.eup %1932  ;;  %1934 = vrcp.f32 %v3155_v6  ;;  %v969_v4 = vmul.f32 %v2590_v33, %v923_v9  ;;  %vm1527_vm9 = vweird.f32 %v1929_v16  ;;  %vm3171_vm10 = vcmp.eq.f32.partialorder %v1455_v53, 8.507059e+37 }
 0x1ff   : > { %1732 = vst.msk [vmem:[%s2686_s30 + $0x68] sm:$0xff] %vm1718_vm4, %v1699_v59  ;;  %v1559_v57 = vsel %vm1558_vm8, %v1927_v47, %v1555_v32  ;;  %v1524_v22 = vmul.f32 %v1929_v16, %v1523_v61  ;;  %v1447_v49 = vmul.f32 %v1933_v51, %v3125_v46  ;;  %v1605_v56 = vand.u32 2147483647, %v3155_v6  ;;  %vm1528_vm11 = vmor %vm1526_vm5, %vm1527_vm9 }
 0x200   : > { %v1564_v28 = vsel %vm3133_vm1, %v1563_v60, %v1559_v57  ;;  %v1607_v45 = vand.u32 2147483648, %v3155_v6  ;;  %1936 = vpow2.f32 %v1158_v24  ;;  %v1097_v18 = vsub.f32 0.0, %v3160_v48 }
 0x201   : > { %v1709_v35 = vmul.f32 %v1564_v28, %v3023_v17  ;;  %v1525_v58 = vadd.f32 %v1929_v16, %v1524_v22  ;;  %v1448_v27 = vsub.f32 1.0, %v1447_v49  ;;  %vm1452_vm12 = vweird.f32 %v1933_v51 }
 0x202   : > { %v3184_v47 = vadd.f32 %v3092_v52, %v1039_v19  ;;  %v1001_v7 = vadd.f32 %v969_v4, %v2604_v43  ;;  %v964_v9 = vmul.f32 %v2590_v33, %v3118_v0  ;;  %v1148_v21 = vmul.f32 1.442695, %v1097_v18  ;;  %vm1453_vm13 = vmor %vm1451_vm7, %vm1452_vm12 }
 0x203   : > { %1742 = vst.msk [vmem:[%s2686_s30 + $0xb8] sm:$0xff] %vm1718_vm4, %v1709_v35  ;;  %v1529_v5 = vsel %vm1528_vm11, %v1929_v16, %v1525_v58  ;;  %v1449_v17 = vmul.f32 %v1933_v51, %v1448_v27  ;;  %v972_v44 = vmul.f32 %v2590_v33, %v935_v50  ;;  %v967_v39 = vmul.f32 %v2590_v33, %v915_v23 }
 0x204   : > { %v1935_v12 = vpop.eup %1934  ;;  %v1534_v38 = vsel %vm3148_vm6, %v1533_v15, %v1529_v5  ;;  %v1107_v60 = vsub.f32 0.0, %v3184_v47  ;;  %v1037_v55 = vmul.f32 %v3075_v11, %v1001_v7  ;;  %v996_v43 = vadd.f32 %v964_v9, %v2595_v29 }
 0x205   : > { %v1707_v0 = vmul.f32 %v1534_v38, %v3045_v8  ;;  %v1450_v26 = vadd.f32 %v1933_v51, %v1449_v17  ;;  %v1597_v2 = vmul.f32 %v1935_v12, %v3155_v6  ;;  %1938 = vpow2.f32 %v1148_v21  ;;  %v927_v13 = vpop.permute.xlu1 %926 }
 0x206   : > { %v1937_v40 = vpop.eup %1936  ;;  %v1168_v16 = vmul.f32 1.442695, %v1107_v60  ;;  %v3204_v36 = vadd.f32 %v3092_v52, %v1037_v55  ;;  %v1032_v42 = vmul.f32 %v3075_v11, %v996_v43  ;;  %v1004_v3 = vadd.f32 %v972_v44, %v2624_v25 }
 0x207   : > { %1740 = vst.msk [vmem:[%s2686_s30 + $0xa8] sm:$0xff] %vm1718_vm4, %v1707_v0  ;;  %v1454_v29 = vsel %vm1453_vm13, %v1933_v51, %v1450_v26  ;;  %v1598_v8 = vsub.f32 1.0, %v1597_v2  ;;  %v3209_v62 = vadd.f32 1.0, %v1937_v40  ;;  %vm1602_vm14 = vweird.f32 %v1935_v12 }
 0x208   : > { %v1459_v46 = vsel %vm3171_vm10, %v1458_v10, %v1454_v29  ;;  %1940 = vpow2.f32 %v1168_v16  ;;  %v1105_v20 = vsub.f32 0.0, %v3204_v36  ;;  %v3216_v31 = vadd.f32 %v3092_v52, %v1032_v42 }
 0x209   : > { %v1702_v53 = vmul.f32 %v1459_v46, %v3057_v37  ;;  %v1599_v54 = vmul.f32 %v1935_v12, %v1598_v8  ;;  %1942 = vrcp.f32 %v3209_v62  ;;  %vm1601_vm15 = vweird.f32 %v3155_v6 }
 0x20a   : > { %v1164_v15 = vmul.f32 1.442695, %v1105_v20  ;;  %v1100_v25 = vsub.f32 0.0, %v3216_v31  ;;  %v1040_v59 = vmul.f32 %v3075_v11, %v1004_v3  ;;  %v999_v32 = vadd.f32 %v967_v39, %v2620_v63  ;;  %vm1603_vm0 = vmor %vm1601_vm15, %vm1602_vm14 }
 0x20b   : > { %1735 = vst.msk [vmem:[%s2686_s30 + $0x80] sm:$0xff] %vm1718_vm4, %v1702_v53  ;;  %v1600_v24 = vadd.f32 %v1935_v12, %v1599_v54  ;;  %v970_v61 = vmul.f32 %v2590_v33, %v927_v13  ;;  %v1939_v51 = vpop.eup %1938  ;;  %vm1606_vm1 = vcmp.eq.f32.partialorder %v1605_v56, 8.507059e+37  ;;  %v1608_v37 = vor.u32 1.1754944e-38, %v1607_v45 }
 0x20c   : > { %1944 = vpow2.f32 %v1164_v15  ;;  %v1154_v10 = vmul.f32 1.442695, %v1100_v25  ;;  %v3227_v19 = vadd.f32 1.0, %v1939_v51  ;;  %v3230_v4 = vadd.f32 %v3092_v52, %v1040_v59 }
 0x20d   : > { %v1604_v6 = vsel %vm1603_vm0, %v1935_v12, %v1600_v24  ;;  %v1035_v23 = vmul.f32 %v3075_v11, %v999_v32  ;;  %v1002_v63 = vadd.f32 %v970_v61, %v2634_v34  ;;  %v1575_v45 = vand.u32 2147483647, %v3209_v62  ;;  %v939_v18 = vpop.permute.xlu1 %938 }
 0x20e   : > { %v1941_v57 = vpop.eup %1940  ;;  %v1609_v22 = vsel %vm1606_vm1, %v1608_v37, %v1604_v6  ;;  %1946 = vpow2.f32 %v1154_v10  ;;  %v1108_v50 = vsub.f32 0.0, %v3230_v4  ;;  %vm1571_vm2 = vweird.f32 %v3209_v62 }
 0x20f   : > { %v1943_v49 = vpop.eup %1942  ;;  %v1712_v14 = vmul.f32 %v1609_v22, %v3095_v41  ;;  %1948 = vrcp.f32 %v3227_v19  ;;  %v3237_v56 = vadd.f32 1.0, %v1941_v57  ;;  %v3244_v35 = vadd.f32 %v3092_v52, %v1035_v23 }
 0x210   : > { %v1567_v28 = vmul.f32 %v1943_v49, %v3209_v62  ;;  %v1038_v34 = vmul.f32 %v3075_v11, %v1002_v63  ;;  %v1577_v41 = vand.u32 2147483648, %v3209_v62  ;;  %v1500_v7 = vand.u32 2147483647, %v3227_v19 }
 0x211   : > { %1745 = vst.msk [vmem:[%s2686_s30 + $0xd0] sm:$0xff] %vm1718_vm4, %v1712_v14  ;;  %1950 = vrcp.f32 %v3237_v56  ;;  %v1170_v5 = vmul.f32 1.442695, %v1108_v50  ;;  %vm1572_vm3 = vweird.f32 %v1943_v49  ;;  %v1103_v44 = vsub.f32 0.0, %v3244_v35 }
 0x212   : > { %v1945_v58 = vpop.eup %1944  ;;  %v1568_v27 = vsub.f32 1.0, %v1567_v28  ;;  %v3255_v12 = vadd.f32 %v3092_v52, %v1038_v34  ;;  %vm3257_vm5 = vcmp.eq.f32.partialorder %v1575_v45, 8.507059e+37  ;;  %v1502_v55 = vand.u32 2147483648, %v3227_v19  ;;  %vm1573_vm7 = vmor %vm1571_vm2, %vm1572_vm3 }
 0x213   : > { %v3251_v9 = vadd.f32 1.0, %v1945_v58  ;;  %v973_v43 = vmul.f32 %v2590_v33, %v939_v18  ;;  %v1578_v26 = vor.u32 1.1754944e-38, %v1577_v41  ;;  %vm1496_vm6 = vweird.f32 %v3227_v19 }
 0x214   : > { %v1947_v17 = vpop.eup %1946  ;;  %v1569_v21 = vmul.f32 %v1943_v49, %v1568_v27  ;;  %vm3268_vm8 = vcmp.eq.f32.partialorder %v1500_v7, 8.507059e+37  ;;  %v1160_v16 = vmul.f32 1.442695, %v1103_v44  ;;  %v1652_v8 = vand.u32 2147483648, %v3237_v56 }
 0x215   : > { %v1949_v38 = vpop.eup %1948  ;;  %1952 = vrcp.f32 %v3251_v9  ;;  %v3272_v40 = vadd.f32 1.0, %v1947_v17  ;;  %v1106_v3 = vsub.f32 0.0, %v3255_v12  ;;  %v1503_v46 = vor.u32 1.1754944e-38, %v1502_v55 }
 0x216   : > { %v1570_v0 = vadd.f32 %v1943_v49, %v1569_v21  ;;  %v1492_v2 = vmul.f32 %v1949_v38, %v3227_v19  ;;  %1954 = vpow2.f32 %v1170_v5  ;;  %v1005_v13 = vadd.f32 %v973_v43, %v2652_v1 }
 0x217   : > { %v1951_v42 = vpop.eup %1950  ;;  %vm1497_vm9 = vweird.f32 %v1949_v38  ;;  %1956 = vrcp.f32 %v3272_v40  ;;  %vm1646_vm10 = vweird.f32 %v3237_v56  ;;  %v1650_v24 = vand.u32 2147483647, %v3237_v56 }
 0x218   : > { %v1574_v29 = vsel %vm1573_vm7, %v1943_v49, %v1570_v0  ;;  %v1493_v33 = vsub.f32 1.0, %v1492_v2  ;;  %v1642_v20 = vmul.f32 %v1951_v42, %v3237_v56  ;;  %1958 = vpow2.f32 %v1160_v16  ;;  %vm1498_vm11 = vmor %vm1496_vm6, %vm1497_vm9 }
 0x219   : > { %v1579_v62 = vsel %vm3257_vm5, %v1578_v26, %v1574_v29  ;;  %v1653_v32 = vor.u32 1.1754944e-38, %v1652_v8  ;;  %v1166_v1 = vmul.f32 1.442695, %v1106_v3  ;;  %vm1647_vm12 = vweird.f32 %v1951_v42 }
 0x21a   : > { %v1710_v53 = vmul.f32 %v1579_v62, %v3131_v30  ;;  %v1494_v54 = vmul.f32 %v1949_v38, %v1493_v33  ;;  %v1643_v25 = vsub.f32 1.0, %v1642_v20  ;;  %v1620_v37 = vand.u32 2147483647, %v3251_v9  ;;  %vm1648_vm13 = vmor %vm1646_vm10, %vm1647_vm12 }
 0x21b   : > { %v1953_v15 = vpop.eup %1952  ;;  %v1041_v10 = vmul.f32 %v3075_v11, %v1005_v13  ;;  %1960 = vpow2.f32 %v1166_v1  ;;  %v1622_v49 = vand.u32 2147483648, %v3251_v9  ;;  %vm1651_vm15 = vcmp.eq.f32.partialorder %v1650_v24, 8.507059e+37 }
 0x21c   : > { %1743 = vst.msk [vmem:[%s2686_s30 + $0xc0] sm:$0xff] %vm1718_vm4, %v1710_v53  ;;  %v1495_v59 = vadd.f32 %v1949_v38, %v1494_v54  ;;  %v1612_v61 = vmul.f32 %v1953_v15, %v3251_v9  ;;  %v1955_v51 = vpop.eup %1954  ;;  %v1644_v30 = vmul.f32 %v1951_v42, %v1643_v25  ;;  %vm1617_vm14 = vweird.f32 %v1953_v15 }
 0x21d   : > { %v3291_v57 = vadd.f32 1.0, %v1955_v51  ;;  %v3297_v19 = vadd.f32 %v3092_v52, %v1041_v10  ;;  %v1957_v14 = vpop.eup %1956  ;;  %vm1616_vm0 = vweird.f32 %v3251_v9  ;;  %v1623_v27 = vor.u32 1.1754944e-38, %v1622_v49 }
 0x21e   : > { %v1499_v6 = vsel %vm1498_vm11, %v1949_v38, %v1495_v59  ;;  %v1613_v23 = vsub.f32 1.0, %v1612_v61  ;;  %v1645_v63 = vadd.f32 %v1951_v42, %v1644_v30  ;;  %v1959_v45 = vpop.eup %1958  ;;  %v1537_v34 = vmul.f32 %v1957_v14, %v3272_v40  ;;  %vm1618_vm1 = vmor %vm1616_vm0, %vm1617_vm14 }
 0x21f   : > { %v1504_v22 = vsel %vm3268_vm8, %v1503_v46, %v1499_v6  ;;  %1962 = vrcp.f32 %v3291_v57  ;;  %v1109_v18 = vsub.f32 0.0, %v3297_v19  ;;  %vm1621_vm2 = vcmp.eq.f32.partialorder %v1620_v37, 8.507059e+37 }
 0x220   : > { %v1705_v28 = vmul.f32 %v1504_v22, %v3160_v48  ;;  %v1614_v11 = vmul.f32 %v1953_v15, %v1613_v23  ;;  %v1649_v50 = vsel %vm1648_vm13, %v1951_v42, %v1645_v63  ;;  %v1199_v48 = vadd.f32 1.0, %v1959_v45 }
 0x221   : > { %v1654_v52 = vsel %vm1651_vm15, %v1653_v32, %v1649_v50  ;;  %v1538_v41 = vsub.f32 1.0, %v1537_v34  ;;  %v1961_v7 = vpop.eup %1960  ;;  %v1547_v17 = vand.u32 2147483648, %v3272_v40  ;;  %vm1542_vm3 = vweird.f32 %v1957_v14 }
 0x222   : > { %1738 = vst.msk [vmem:[%s2686_s30 + $0x98] sm:$0xff] %vm1718_vm4, %v1705_v28  ;;  %v1615_v58 = vadd.f32 %v1953_v15, %v1614_v11  ;;  %v1715_v56 = vmul.f32 %v1654_v52, %v3184_v47  ;;  %1964 = vrcp.f32 %v1199_v48  ;;  %v1545_v9 = vand.u32 2147483647, %v3272_v40 }
 0x223   : > { %v1539_v44 = vmul.f32 %v1957_v14, %v1538_v41  ;;  %v1202_v60 = vadd.f32 1.0, %v1961_v7  ;;  %v1172_v55 = vmul.f32 1.442695, %v1109_v18  ;;  %vm1541_vm5 = vweird.f32 %v3272_v40 }
 0x224   : > { %v1619_v5 = vsel %vm1618_vm1, %v1953_v15, %v1615_v58  ;;  %1748 = vst.msk [vmem:[%s2686_s30 + $0xe8] sm:$0xff] %vm1718_vm4, %v1715_v56  ;;  %vm1543_vm6 = vmor %vm1541_vm5, %vm1542_vm3  ;;  %v1548_v26 = vor.u32 1.1754944e-38, %v1547_v17  ;;  %vm1546_vm7 = vcmp.eq.f32.partialorder %v1545_v9, 8.507059e+37  ;;  %v1667_v29 = vand.u32 2147483648, %v3291_v57 }
 0x225   : > { %v1624_v21 = vsel %vm1621_vm2, %v1623_v27, %v1619_v5  ;;  %v1963_v47 = vpop.eup %1962  ;;  %v1540_v43 = vadd.f32 %v1957_v14, %v1539_v44  ;;  %1966 = vrcp.f32 %v1202_v60  ;;  %vm1661_vm9 = vweird.f32 %v3291_v57 }
 0x226   : > { %v1713_v38 = vmul.f32 %v1624_v21, %v3204_v36  ;;  %v1657_v0 = vmul.f32 %v1963_v47, %v3291_v57  ;;  %1968 = vpow2.f32 %v1172_v55  ;;  %v1665_v36 = vand.u32 2147483647, %v3291_v57 }
 0x227   : > { %v1544_v2 = vsel %vm1543_vm6, %v1957_v14, %v1540_v43  ;;  %vm1662_vm8 = vweird.f32 %v1963_v47  ;;  %v1668_v20 = vor.u32 1.1754944e-38, %v1667_v29  ;;  %v1590_v13 = vand.u32 2147483647, %v1199_v48 }
 0x228   : > { %1746 = vst.msk [vmem:[%s2686_s30 + $0xd8] sm:$0xff] %vm1718_vm4, %v1713_v38  ;;  %v1658_v39 = vsub.f32 1.0, %v1657_v0  ;;  %v1965_v16 = vpop.eup %1964  ;;  %v1549_v42 = vsel %vm1546_vm7, %v1548_v26, %v1544_v2  ;;  %vm1663_vm10 = vmor %vm1661_vm9, %vm1662_vm8  ;;  %vm1666_vm11 = vcmp.eq.f32.partialorder %v1665_v36, 8.507059e+37  ;;  %v1592_v53 = vand.u32 2147483648, %v1199_v48 }
 0x229   : > { %v1708_v40 = vmul.f32 %v1549_v42, %v3216_v31  ;;  %v1582_v8 = vmul.f32 %v1965_v16, %v1199_v48  ;;  %vm1587_vm12 = vweird.f32 %v1965_v16  ;;  %vm1586_vm13 = vweird.f32 %v1199_v48 }
 0x22a   : > { %v1659_v33 = vmul.f32 %v1963_v47, %v1658_v39  ;;  %vm1588_vm14 = vmor %vm1586_vm13, %vm1587_vm12  ;;  %vm1591_vm15 = vcmp.eq.f32.partialorder %v1590_v13, 8.507059e+37  ;;  %v1593_v51 = vor.u32 1.1754944e-38, %v1592_v53  ;;  %v1637_v30 = vand.u32 2147483648, %v1202_v60 }
 0x22b   : > { %1741 = vst.msk [vmem:[%s2686_s30 + $0xb0] sm:$0xff] %vm1718_vm4, %v1708_v40  ;;  %v1583_v62 = vsub.f32 1.0, %v1582_v8  ;;  %v1967_v46 = vpop.eup %1966  ;;  %v1635_v6 = vand.u32 2147483647, %v1202_v60  ;;  %vm1631_vm1 = vweird.f32 %v1202_v60 }
 0x22c   : > { %v1660_v3 = vadd.f32 %v1963_v47, %v1659_v33  ;;  %v1969_v54 = vpop.eup %1968  ;;  %v1627_v31 = vmul.f32 %v1967_v46, %v1202_v60  ;;  %vm1632_vm0 = vweird.f32 %v1967_v46  ;;  %v1638_v22 = vor.u32 1.1754944e-38, %v1637_v30 }
 0x22d   : > { %v1584_v25 = vmul.f32 %v1965_v16, %v1583_v62  ;;  %v1205_v59 = vadd.f32 1.0, %v1969_v54  ;;  %vm1633_vm2 = vmor %vm1631_vm1, %vm1632_vm0  ;;  %vm1636_vm3 = vcmp.eq.f32.partialorder %v1635_v6, 8.507059e+37 }
 0x22e   : > { %v1664_v15 = vsel %vm1663_vm10, %v1963_v47, %v1660_v3  ;;  %v1628_v1 = vsub.f32 1.0, %v1627_v31 }
 0x22f   : > { %v1669_v24 = vsel %vm1666_vm11, %v1668_v20, %v1664_v15  ;;  %v1585_v61 = vadd.f32 %v1965_v16, %v1584_v25  ;;  %1970 = vrcp.f32 %v1205_v59  ;;  %v1682_v50 = vand.u32 2147483648, %v1205_v59 }
 0x230   : > { %v1716_v32 = vmul.f32 %v1669_v24, %v3230_v4  ;;  %v1629_v10 = vmul.f32 %v1967_v46, %v1628_v1  ;;  %vm1676_vm6 = vweird.f32 %v1205_v59 }
 0x231   : > { %v1589_v37 = vsel %vm1588_vm14, %v1965_v16, %v1585_v61  ;;  %v1683_v58 = vor.u32 1.1754944e-38, %v1682_v50 }
 0x232   : > { %1749 = vst.msk [vmem:[%s2686_s30 + $0xf0] sm:$0xff] %vm1718_vm4, %v1716_v32  ;;  %v1594_v23 = vsel %vm1591_vm15, %v1593_v51, %v1589_v37  ;;  %v1630_v4 = vadd.f32 %v1967_v46, %v1629_v10 }
 0x233   : > { %v1711_v57 = vmul.f32 %v1594_v23, %v3244_v35  ;;  %v1680_v35 = vand.u32 2147483647, %v1205_v59 }
 0x234   : > { %v1634_v63 = vsel %vm1633_vm2, %v1967_v46, %v1630_v4 }
 0x235   : > { %1744 = vst.msk [vmem:[%s2686_s30 + $0xc8] sm:$0xff] %vm1718_vm4, %v1711_v57  ;;  %v1971_v49 = vpop.eup %1970  ;;  %v1639_v14 = vsel %vm1636_vm3, %v1638_v22, %v1634_v63  ;;  %vm1681_vm8 = vcmp.eq.f32.partialorder %v1680_v35, 8.507059e+37 }
 0x236   : > { %v1714_v28 = vmul.f32 %v1639_v14, %v3255_v12  ;;  %v1672_v11 = vmul.f32 %v1971_v49, %v1205_v59  ;;  %vm1677_vm5 = vweird.f32 %v1971_v49 }
 0x237   : > { %vm1678_vm7 = vmor %vm1676_vm6, %vm1677_vm5 }
 0x238   : > { %1747 = vst.msk [vmem:[%s2686_s30 + $0xe0] sm:$0xff] %vm1718_vm4, %v1714_v28  ;;  %v1673_v45 = vsub.f32 1.0, %v1672_v11 }
 0x23a   : > { %v1674_v34 = vmul.f32 %v1971_v49, %v1673_v45 }
 0x23c   : > { %v1675_v52 = vadd.f32 %v1971_v49, %v1674_v34 }
 0x23e   : > { %v1679_v48 = vsel %vm1678_vm7, %v1971_v49, %v1675_v52 }
 0x23f   : > { %v1684_v56 = vsel %vm1681_vm8, %v1683_v58, %v1679_v48 }
 0x240   : > { %v1717_v27 = vmul.f32 %v1684_v56, %v3297_v19 }
 0x242   : > { %1750 = vst.msk [vmem:[%s2686_s30 + $0xf8] sm:$0xff] %vm1718_vm4, %v1717_v27 }
 0x243 PF: > { %s14_s15 = sadd.s32 1, %s1980_s15  }
 0x244   : > { %p11_p4 = scmp.ge.s32.totalorder %s14_s15, 4  }
 0x246   :  { %13 = sbr.rel (!%p11_p4) target bundleno = 1 (0x1), region = 66 }

</bundles_post_ra>
